<compile_context>
chip_gen: v7x
topology: tpu7x:2x2x1
jax: 0.10.0
libtpu: 0.0.40
codegen_flags: <defaults>
</compile_context>

<pallas_src>
import functools

import numpy as np

import jax
import jax.numpy as jnp
from jax.experimental import pallas as pl
from jax.experimental.pallas import tpu as pltpu

_EPS = 1e-5
_VMEM_LIMIT = 32 * 1024 * 1024  # explicit budget; safe on v5e/v6e (128 MiB) and v7x (64 MiB)


# ----------------------------- Pallas kernels ------------------------------

def _conv1_kernel(x_ref, w1_ref, b1_ref, y1_ref, s1_ref):
    # 1x1 conv (as (Cmid,Cin)@(Cin,TP) MXU matmul) + bias; emit partial BN stats.
    x = x_ref[0]                                                       # (Cin, TP)
    y1 = jnp.dot(w1_ref[...], x, preferred_element_type=jnp.float32) + b1_ref[...]
    y1_ref[0] = y1
    s1_ref[0, 0, :, 0:1] = jnp.sum(y1, axis=1, keepdims=True)
    s1_ref[0, 0, :, 1:2] = jnp.sum(y1 * y1, axis=1, keepdims=True)


def _conv1_skip_kernel(x_ref, w1_ref, b1_ref, ws_ref, bs_ref, y1_ref, s1_ref, ss_ref):
    # Same as above, plus partial BN stats of the raw 1x1 skip conv (the skip
    # activation itself is recomputed in the fused final kernel).
    x = x_ref[0]                                                       # (Cin, TP)
    y1 = jnp.dot(w1_ref[...], x, preferred_element_type=jnp.float32) + b1_ref[...]
    y1_ref[0] = y1
    s1_ref[0, 0, :, 0:1] = jnp.sum(y1, axis=1, keepdims=True)
    s1_ref[0, 0, :, 1:2] = jnp.sum(y1 * y1, axis=1, keepdims=True)
    ys = jnp.dot(ws_ref[...], x, preferred_element_type=jnp.float32) + bs_ref[...]
    ss_ref[0, 0, :, 0:1] = jnp.sum(ys, axis=1, keepdims=True)
    ss_ref[0, 0, :, 1:2] = jnp.sum(ys * ys, axis=1, keepdims=True)


def _conv3x3_kernel(y1_ref, sc1_ref, sh1_ref, w2_ref, b2_ref, m_ref,
                    y2_ref, s2_ref, *, offs):
    # BN1-apply + ReLU fused with the 3x3 conv, done as 9 accumulated MXU dots
    # over lane-rolled, border-masked copies of the whole (Cmid, H*W) image.
    h1 = jnp.maximum(y1_ref[0] * sc1_ref[...] + sh1_ref[...], 0.0)     # (Cmid, P)
    P = h1.shape[1]
    cm_out = w2_ref.shape[1]
    acc = jnp.zeros((cm_out, P), jnp.float32)
    for t, off in enumerate(offs):
        if off == 0:
            src = h1
        else:
            # src[:, p] = h1[:, (p + off) mod P]; wrapped / out-of-image
            # positions are zeroed by the precomputed mask.
            src = pltpu.roll(h1, (-off) % P, 1)
        src = src * m_ref[t]                                           # (Cmid,P)*(1,P)
        acc = acc + jnp.dot(w2_ref[t], src, preferred_element_type=jnp.float32)
    y2 = acc + b2_ref[...]
    y2_ref[0] = y2
    s2_ref[0, :, 0:1] = jnp.sum(y2, axis=1, keepdims=True)
    s2_ref[0, :, 1:2] = jnp.sum(y2 * y2, axis=1, keepdims=True)


def _conv3_stats_kernel(y2_ref, sc2_ref, sh2_ref, w3_ref, b3_ref, s3_ref):
    # BN2-apply + ReLU + final 1x1 conv, emitting only its partial BN stats
    # (y3 is cheap to recompute in the final fused kernel).
    h2 = jnp.maximum(y2_ref[0] * sc2_ref[...] + sh2_ref[...], 0.0)
    y3 = jnp.dot(w3_ref[...], h2, preferred_element_type=jnp.float32) + b3_ref[...]
    s3_ref[0, 0, :, 0:1] = jnp.sum(y3, axis=1, keepdims=True)
    s3_ref[0, 0, :, 1:2] = jnp.sum(y3 * y3, axis=1, keepdims=True)


def _final_identity_kernel(y2_ref, x_ref, sc2_ref, sh2_ref, w3_ref, b3_ref,
                           sc3_ref, sh3_ref, o_ref):
    # BN2 + ReLU + 1x1 conv + BN3 + identity-skip residual add, fused.
    h2 = jnp.maximum(y2_ref[0] * sc2_ref[...] + sh2_ref[...], 0.0)
    y3 = jnp.dot(w3_ref[...], h2, preferred_element_type=jnp.float32) + b3_ref[...]
    o_ref[0] = y3 * sc3_ref[...] + sh3_ref[...] + x_ref[0]


def _final_skip_kernel(y2_ref, x_ref, sc2_ref, sh2_ref, w3_ref, b3_ref,
                       sc3_ref, sh3_ref, ws_ref, bs_ref, scs_ref, shs_ref, o_ref):
    # BN2 + ReLU + 1x1 conv + BN3 + (1x1 conv + BN) skip + residual add, fused.
    h2 = jnp.maximum(y2_ref[0] * sc2_ref[...] + sh2_ref[...], 0.0)
    y3 = jnp.dot(w3_ref[...], h2, preferred_element_type=jnp.float32) + b3_ref[...]
    main = y3 * sc3_ref[...] + sh3_ref[...]
    ys = jnp.dot(ws_ref[...], x_ref[0], preferred_element_type=jnp.float32) + bs_ref[...]
    o_ref[0] = main + ys * scs_ref[...] + shs_ref[...]


# ----------------------------- wrapper helpers ------------------------------

def _const_spec(a):
    # Whole small array (weights / bias / scale / shift / masks) as one constant block.
    zeros = (0,) * a.ndim
    return pl.BlockSpec(a.shape, lambda *_: zeros)


def _choose_tp(P):
    # Spatial tile (lane axis). Keep it lane-aligned and evenly dividing P.
    if P <= 2048:
        return P
    for t in (2048, 1024, 512, 256, 128):
        if P % t == 0:
            return t
    return P


def _compiler_params(n_axes):
    return pltpu.CompilerParams(
        dimension_semantics=("parallel",) * n_axes,
        vmem_limit_bytes=_VMEM_LIMIT,
    )


def _make_masks_offsets(H, W):
    # Per-tap flattened-index offsets and 0/1 validity masks for the 3x3 conv
    # (padding=1) done via lane rolls on the flattened (C, H*W) image.
    P = H * W
    ys, xs = np.meshgrid(np.arange(H), np.arange(W), indexing='ij')
    masks = np.zeros((9, 1, P), np.float32)
    offs = []
    for dy in range(3):
        for dx in range(3):
            oy, ox = dy - 1, dx - 1
            valid = ((ys + oy >= 0) & (ys + oy < H) & (xs + ox >= 0) & (xs + ox < W))
            masks[dy * 3 + dx, 0] = valid.reshape(P).astype(np.float32)
            offs.append(oy * W + ox)
    return jnp.asarray(masks), tuple(offs)


def _bn_affine(stats, count, gamma, beta):
    # Turn partial (sum, sumsq) per channel into train-mode BN scale/shift:
    # BN(y) = y * scale + shift, with biased variance and eps = 1e-5.
    c = stats.shape[-2]
    s = stats.reshape(-1, c, 2).sum(axis=0)            # (C, 2)
    mean = s[:, 0:1] / count
    var = s[:, 1:2] / count - mean * mean
    scale = gamma * jax.lax.rsqrt(var + _EPS)
    shift = beta - mean * scale
    return scale, shift


# ------------------------------- forward pass -------------------------------

@jax.jit
def hourglass_residual(x_nchw, params):
    """HourGlassResidual forward. x_nchw: (N, Cin, H, W) -> (N, Cout, H, W)."""
    x = x_nchw.astype(jnp.float32)
    N, Cin, H, W = x.shape
    P = H * W
    M = float(N * P)
    Cmid = params['w1'].shape[0]
    Cout = params['w3'].shape[0]
    has_skip = 'ws' in params

    x3 = x.reshape(N, Cin, P)                           # free reshape, stays NCHW
    TP = _choose_tp(P)
    PT = P // TP

    def act_spec(C):
        return pl.BlockSpec((1, C, TP), lambda n, p: (n, 0, p))

    def stat_spec(C):
        return pl.BlockSpec((1, 1, C, 2), lambda n, p: (n, p, 0, 0))

    # ---- stage 1: 1x1 conv (+ raw skip-conv stats), partial BN1 stats -------
    if has_skip:
        y1, s1, ss = pl.pallas_call(
            _conv1_skip_kernel,
            grid=(N, PT),
            in_specs=[act_spec(Cin),
                      _const_spec(params['w1']), _const_spec(params['b1']),
                      _const_spec(params['ws']), _const_spec(params['bs'])],
            out_specs=[act_spec(Cmid), stat_spec(Cmid), stat_spec(Cout)],
            out_shape=[jax.ShapeDtypeStruct((N, Cmid, P), jnp.float32),
                       jax.ShapeDtypeStruct((N, PT, Cmid, 2), jnp.float32),
                       jax.ShapeDtypeStruct((N, PT, Cout, 2), jnp.float32)],
            compiler_params=_compiler_params(2),
        )(x3, params['w1'], params['b1'], params['ws'], params['bs'])
    else:
        y1, s1 = pl.pallas_call(
            _conv1_kernel,
            grid=(N, PT),
            in_specs=[act_spec(Cin),
                      _const_spec(params['w1']), _const_spec(params['b1'])],
            out_specs=[act_spec(Cmid), stat_spec(Cmid)],
            out_shape=[jax.ShapeDtypeStruct((N, Cmid, P), jnp.float32),
                       jax.ShapeDtypeStruct((N, PT, Cmid, 2), jnp.float32)],
            compiler_params=_compiler_params(2),
        )(x3, params['w1'], params['b1'])
    sc1, sh1 = _bn_affine(s1, M, params['g1'], params['be1'])

    # ---- stage 2: BN1 + ReLU + 3x3 conv (9-tap roll/mask), partial BN2 stats -
    masks, offs = _make_masks_offsets(H, W)
    y2, s2 = pl.pallas_call(
        functools.partial(_conv3x3_kernel, offs=offs),
        grid=(N,),
        in_specs=[pl.BlockSpec((1, Cmid, P), lambda n: (n, 0, 0)),
                  _const_spec(sc1), _const_spec(sh1),
                  _const_spec(params['w2t']), _const_spec(params['b2']),
                  _const_spec(masks)],
        out_specs=[pl.BlockSpec((1, Cmid, P), lambda n: (n, 0, 0)),
                   pl.BlockSpec((1, Cmid, 2), lambda n: (n, 0, 0))],
        out_shape=[jax.ShapeDtypeStruct((N, Cmid, P), jnp.float32),
                   jax.ShapeDtypeStruct((N, Cmid, 2), jnp.float32)],
        compiler_params=_compiler_params(1),
    )(y1, sc1, sh1, params['w2t'], params['b2'], masks)
    sc2, sh2 = _bn_affine(s2, M, params['g2'], params['be2'])

    # ---- stage 3a: partial BN3 stats of the final 1x1 conv ------------------
    s3 = pl.pallas_call(
        _conv3_stats_kernel,
        grid=(N, PT),
        in_specs=[act_spec(Cmid), _const_spec(sc2), _const_spec(sh2),
                  _const_spec(params['w3']), _const_spec(params['b3'])],
        out_specs=stat_spec(Cout),
        out_shape=jax.ShapeDtypeStruct((N, PT, Cout, 2), jnp.float32),
        compiler_params=_compiler_params(2),
    )(y2, sc2, sh2, params['w3'], params['b3'])
    sc3, sh3 = _bn_affine(s3, M, params['g3'], params['be3'])

    # ---- stage 3b: BN2+ReLU + 1x1 conv + BN3 + skip + residual add ----------
    if has_skip:
        scs, shs = _bn_affine(ss, M, params['gs'], params['bes'])
        out3 = pl.pallas_call(
            _final_skip_kernel,
            grid=(N, PT),
            in_specs=[act_spec(Cmid), act_spec(Cin),
                      _const_spec(sc2), _const_spec(sh2),
                      _const_spec(params['w3']), _const_spec(params['b3']),
                      _const_spec(sc3), _const_spec(sh3),
                      _const_spec(params['ws']), _const_spec(params['bs']),
                      _const_spec(scs), _const_spec(shs)],
            out_specs=act_spec(Cout),
            out_shape=jax.ShapeDtypeStruct((N, Cout, P), jnp.float32),
            compiler_params=_compiler_params(2),
        )(y2, x3, sc2, sh2, params['w3'], params['b3'], sc3, sh3,
          params['ws'], params['bs'], scs, shs)
    else:
        out3 = pl.pallas_call(
            _final_identity_kernel,
            grid=(N, PT),
            in_specs=[act_spec(Cmid), act_spec(Cin),
                      _const_spec(sc2), _const_spec(sh2),
                      _const_spec(params['w3']), _const_spec(params['b3']),
                      _const_spec(sc3), _const_spec(sh3)],
            out_specs=act_spec(Cout),
            out_shape=jax.ShapeDtypeStruct((N, Cout, P), jnp.float32),
            compiler_params=_compiler_params(2),
        )(y2, x3, sc2, sh2, params['w3'], params['b3'], sc3, sh3)

    return out3.reshape(N, Cout, H, W)                   # already NCHW


# ----------------------------- params & reference ---------------------------

def init_params(key, cin, cout):
    """Deterministic synthetic parameters in PyTorch (out, in) weight layout.
    The 3x3 conv is stored as 9 taps: w2t[kh*3+kw, c_out, c_in]."""
    cmid = cout // 2
    ks = iter(jax.random.split(key, 20))

    def nrm(shape, s):
        return (s * jax.random.normal(next(ks), shape)).astype(jnp.float32)

    p = {
        'w1': nrm((cmid, cin), 0.4), 'b1': nrm((cmid, 1), 0.1),
        'g1': 1.0 + nrm((cmid, 1), 0.1), 'be1': nrm((cmid, 1), 0.1),
        'w2t': nrm((9, cmid, cmid), 0.2), 'b2': nrm((cmid, 1), 0.1),
        'g2': 1.0 + nrm((cmid, 1), 0.1), 'be2': nrm((cmid, 1), 0.1),
        'w3': nrm((cout, cmid), 0.4), 'b3': nrm((cout, 1), 0.1),
        'g3': 1.0 + nrm((cout, 1), 0.1), 'be3': nrm((cout, 1), 0.1),
    }
    if cin != cout:
        p.update({'ws': nrm((cout, cin), 0.4), 'bs': nrm((cout, 1), 0.1),
                  'gs': 1.0 + nrm((cout, 1), 0.1), 'bes': nrm((cout, 1), 0.1)})
    return p


def reference(x_nchw, params):
    """Pure-JAX reference (lax.conv) mirroring the PyTorch forward (train-mode BN)."""
    x = jnp.transpose(x_nchw, (0, 2, 3, 1)).astype(jnp.float32)  # NHWC

    def conv(x, w_hwio, b, pad):
        y = jax.lax.conv_general_dilated(
            x, w_hwio, window_strides=(1, 1), padding=pad,
            dimension_numbers=('NHWC', 'HWIO', 'NHWC'))
        return y + b.reshape(1, 1, 1, -1)

    def bn(y, g, be):
        mean = jnp.mean(y, axis=(0, 1, 2), keepdims=True)
        var = jnp.mean((y - mean) ** 2, axis=(0, 1, 2), keepdims=True)
        return ((y - mean) / jnp.sqrt(var + _EPS) * g.reshape(1, 1, 1, -1)
                + be.reshape(1, 1, 1, -1))

    cmid = params['w1'].shape[0]
    w1_hwio = params['w1'].T[None, None]                 # (1,1,Cin,Cmid)
    h = jax.nn.relu(bn(conv(x, w1_hwio, params['b1'], 'VALID'),
                       params['g1'], params['be1']))
    w2_hwio = jnp.transpose(params['w2t'].reshape(3, 3, cmid, cmid), (0, 1, 3, 2))
    h = jax.nn.relu(bn(conv(h, w2_hwio, params['b2'], ((1, 1), (1, 1))),
                       params['g2'], params['be2']))
    w3_hwio = params['w3'].T[None, None]
    main = bn(conv(h, w3_hwio, params['b3'], 'VALID'), params['g3'], params['be3'])
    if 'ws' in params:
        ws_hwio = params['ws'].T[None, None]
        skip = bn(conv(x, ws_hwio, params['bs'], 'VALID'), params['gs'], params['bes'])
    else:
        skip = x
    return jnp.transpose(main + skip, (0, 3, 1, 2))


# ---------------------------------- main ------------------------------------

if __name__ == "__main__":
    key = jax.random.PRNGKey(0)
    kx1, kx2, kp1, kp2 = jax.random.split(key, 4)

    # Case 1: in_channels != out_channels  -> Conv1x1 + BN skip branch.
    x1 = jax.random.normal(kx1, (2, 4, 16, 16), jnp.float32)  # NCHW
    p1 = init_params(kp1, 4, 8)
    out1 = jax.block_until_ready(hourglass_residual(x1, p1))
    ref1 = reference(x1, p1)
    assert out1.shape == (2, 8, 16, 16)
    assert jnp.allclose(out1, ref1, atol=1e-3, rtol=1e-3), \
        float(jnp.max(jnp.abs(out1 - ref1)))

    # Case 2: in_channels == out_channels  -> Identity skip.
    x2 = jax.random.normal(kx2, (2, 8, 16, 16), jnp.float32)  # NCHW
    p2 = init_params(kp2, 8, 8)
    out2 = jax.block_until_ready(hourglass_residual(x2, p2))
    ref2 = reference(x2, p2)
    assert out2.shape == (2, 8, 16, 16)
    assert jnp.allclose(out2, ref2, atol=1e-3, rtol=1e-3), \
        float(jnp.max(jnp.abs(out2 - ref2)))

    print("KERNEL_OK")
</pallas_src>

<mosaic_0001>
module attributes {stable_mosaic.version = 11 : i64} {
  func.func @_conv1_skip_kernel(%arg0: i32, %arg1: i32, %arg2: memref<1x4x256xf32, #tpu.memory_space<vmem>>, %arg3: memref<4x4xf32, #tpu.memory_space<vmem>>, %arg4: memref<4x1xf32, #tpu.memory_space<vmem>>, %arg5: memref<8x4xf32, #tpu.memory_space<vmem>>, %arg6: memref<8x1xf32, #tpu.memory_space<vmem>>, %arg7: memref<1x4x256xf32, #tpu.memory_space<vmem>>, %arg8: memref<1x1x4x2xf32, #tpu.memory_space<vmem>>, %arg9: memref<1x1x8x2xf32, #tpu.memory_space<vmem>>) attributes {dimension_semantics = [#tpu.dimension_semantics<parallel>, #tpu.dimension_semantics<parallel>], iteration_bounds = array<i64: 2, 1>, scalar_prefetch = 0 : i64, scratch_operands = 0 : i64, tpu.core_type = #tpu.core_type<tc>, window_params = [{transform_indices = @transform_0, window_bounds = array<i64: 1, 4, 256>}, {pipeline_mode = #tpu.pipeline_mode<synchronous>, transform_indices = @transform_1, window_bounds = array<i64: 4, 4>}, {pipeline_mode = #tpu.pipeline_mode<synchronous>, transform_indices = @transform_2, window_bounds = array<i64: 4, 1>}, {pipeline_mode = #tpu.pipeline_mode<synchronous>, transform_indices = @transform_3, window_bounds = array<i64: 8, 4>}, {pipeline_mode = #tpu.pipeline_mode<synchronous>, transform_indices = @transform_4, window_bounds = array<i64: 8, 1>}, {transform_indices = @transform_5, window_bounds = array<i64: 1, 4, 256>}, {transform_indices = @transform_6, window_bounds = array<i64: 1, 1, 4, 2>}, {transform_indices = @transform_7, window_bounds = array<i64: 1, 1, 8, 2>}]} {
    %c0 = arith.constant 0 : index
    %c0_0 = arith.constant 0 : index
    %c0_1 = arith.constant 0 : index
    %0 = vector.load %arg2[%c0, %c0_0, %c0_1] : memref<1x4x256xf32, #tpu.memory_space<vmem>>, vector<1x4x256xf32>
    %1 = vector.shape_cast %0 : vector<1x4x256xf32> to vector<4x256xf32>
    %c0_2 = arith.constant 0 : index
    %c0_3 = arith.constant 0 : index
    %2 = vector.load %arg3[%c0_2, %c0_3] : memref<4x4xf32, #tpu.memory_space<vmem>>, vector<4x4xf32>
    %cst = arith.constant dense<0.000000e+00> : vector<4x256xf32>
    %3 = tpu.matmul %2, %1, %cst {dimension_numbers = #tpu.dot_dimension_numbers<[1], [0], [0], [1], [0, 0, 1, 1], [], []>} : vector<4x4xf32>, vector<4x256xf32>, vector<4x256xf32> -> vector<4x256xf32>
    %c0_4 = arith.constant 0 : index
    %c0_5 = arith.constant 0 : index
    %4 = vector.load %arg4[%c0_4, %c0_5] : memref<4x1xf32, #tpu.memory_space<vmem>>, vector<4x1xf32>
    %5 = vector.broadcast %4 : vector<4x1xf32> to vector<4x256xf32>
    %6 = arith.addf %3, %5 : vector<4x256xf32>
    %c0_6 = arith.constant 0 : index
    %c0_7 = arith.constant 0 : index
    %c0_8 = arith.constant 0 : index
    %7 = vector.load %arg7[%c0_6, %c0_7, %c0_8] : memref<1x4x256xf32, #tpu.memory_space<vmem>>, vector<1x4x256xf32>
    %8 = vector.shape_cast %7 : vector<1x4x256xf32> to vector<4x256xf32>
    %9 = vector.shape_cast %6 : vector<4x256xf32> to vector<1x4x256xf32>
    tpu.vector_store %arg7[%c0_6, %c0_7, %c0_8], %9 {strides = array<i32>} : memref<1x4x256xf32, #tpu.memory_space<vmem>>, vector<1x4x256xf32>,
    %cst_9 = arith.constant dense<0.000000e+00> : vector<4xf32>
    %10 = vector.multi_reduction <add>, %6, %cst_9 [1] : vector<4x256xf32> to vector<4xf32>
    %11 = vector.shape_cast %10 : vector<4xf32> to vector<4x1xf32>
    %c0_10 = arith.constant 0 : index
    %c0_11 = arith.constant 0 : index
    %c0_12 = arith.constant 0 : index
    %c0_13 = arith.constant 0 : index
    %12 = vector.load %arg8[%c0_10, %c0_11, %c0_12, %c0_13] : memref<1x1x4x2xf32, #tpu.memory_space<vmem>>, vector<1x1x4x1xf32>
    %13 = vector.shape_cast %12 : vector<1x1x4x1xf32> to vector<4x1xf32>
    %14 = vector.shape_cast %11 : vector<4x1xf32> to vector<1x1x4x1xf32>
    tpu.vector_store %arg8[%c0_10, %c0_11, %c0_12, %c0_13], %14 {strides = array<i32>} : memref<1x1x4x2xf32, #tpu.memory_space<vmem>>, vector<1x1x4x1xf32>,
    %15 = arith.mulf %6, %6 : vector<4x256xf32>
    %cst_14 = arith.constant dense<0.000000e+00> : vector<4xf32>
    %16 = vector.multi_reduction <add>, %15, %cst_14 [1] : vector<4x256xf32> to vector<4xf32>
    %17 = vector.shape_cast %16 : vector<4xf32> to vector<4x1xf32>
    %c0_15 = arith.constant 0 : index
    %c0_16 = arith.constant 0 : index
    %c0_17 = arith.constant 0 : index
    %c1 = arith.constant 1 : index
    %18 = vector.load %arg8[%c0_15, %c0_16, %c0_17, %c1] : memref<1x1x4x2xf32, #tpu.memory_space<vmem>>, vector<1x1x4x1xf32>
    %19 = vector.shape_cast %18 : vector<1x1x4x1xf32> to vector<4x1xf32>
    %20 = vector.shape_cast %17 : vector<4x1xf32> to vector<1x1x4x1xf32>
    tpu.vector_store %arg8[%c0_15, %c0_16, %c0_17, %c1], %20 {strides = array<i32>} : memref<1x1x4x2xf32, #tpu.memory_space<vmem>>, vector<1x1x4x1xf32>,
    %c0_18 = arith.constant 0 : index
    %c0_19 = arith.constant 0 : index
    %21 = vector.load %arg5[%c0_18, %c0_19] : memref<8x4xf32, #tpu.memory_space<vmem>>, vector<8x4xf32>
    %cst_20 = arith.constant dense<0.000000e+00> : vector<8x256xf32>
    %22 = tpu.matmul %21, %1, %cst_20 {dimension_numbers = #tpu.dot_dimension_numbers<[1], [0], [0], [1], [0, 0, 1, 1], [], []>} : vector<8x4xf32>, vector<4x256xf32>, vector<8x256xf32> -> vector<8x256xf32>
    %c0_21 = arith.constant 0 : index
    %c0_22 = arith.constant 0 : index
    %23 = vector.load %arg6[%c0_21, %c0_22] : memref<8x1xf32, #tpu.memory_space<vmem>>, vector<8x1xf32>
    %24 = vector.broadcast %23 : vector<8x1xf32> to vector<8x256xf32>
    %25 = arith.addf %22, %24 : vector<8x256xf32>
    %cst_23 = arith.constant dense<0.000000e+00> : vector<8xf32>
    %26 = vector.multi_reduction <add>, %25, %cst_23 [1] : vector<8x256xf32> to vector<8xf32>
    %27 = vector.shape_cast %26 : vector<8xf32> to vector<8x1xf32>
    %c0_24 = arith.constant 0 : index
    %c0_25 = arith.constant 0 : index
    %c0_26 = arith.constant 0 : index
    %c0_27 = arith.constant 0 : index
    %28 = vector.load %arg9[%c0_24, %c0_25, %c0_26, %c0_27] : memref<1x1x8x2xf32, #tpu.memory_space<vmem>>, vector<1x1x8x1xf32>
    %29 = vector.shape_cast %28 : vector<1x1x8x1xf32> to vector<8x1xf32>
    %30 = vector.shape_cast %27 : vector<8x1xf32> to vector<1x1x8x1xf32>
    tpu.vector_store %arg9[%c0_24, %c0_25, %c0_26, %c0_27], %30 {strides = array<i32>} : memref<1x1x8x2xf32, #tpu.memory_space<vmem>>, vector<1x1x8x1xf32>,
    %31 = arith.mulf %25, %25 : vector<8x256xf32>
    %cst_28 = arith.constant dense<0.000000e+00> : vector<8xf32>
    %32 = vector.multi_reduction <add>, %31, %cst_28 [1] : vector<8x256xf32> to vector<8xf32>
    %33 = vector.shape_cast %32 : vector<8xf32> to vector<8x1xf32>
    %c0_29 = arith.constant 0 : index
    %c0_30 = arith.constant 0 : index
    %c0_31 = arith.constant 0 : index
    %c1_32 = arith.constant 1 : index
    %34 = vector.load %arg9[%c0_29, %c0_30, %c0_31, %c1_32] : memref<1x1x8x2xf32, #tpu.memory_space<vmem>>, vector<1x1x8x1xf32>
    %35 = vector.shape_cast %34 : vector<1x1x8x1xf32> to vector<8x1xf32>
    %36 = vector.shape_cast %33 : vector<8x1xf32> to vector<1x1x8x1xf32>
    tpu.vector_store %arg9[%c0_29, %c0_30, %c0_31, %c1_32], %36 {strides = array<i32>} : memref<1x1x8x2xf32, #tpu.memory_space<vmem>>, vector<1x1x8x1xf32>,
    return
  }
  func.func @transform_0(%arg0: i32, %arg1: i32) -> (i32, i32, i32) {
    %c0_i32 = arith.constant 0 : i32
    %c0_i32_0 = arith.constant 0 : i32
    return %arg0, %c0_i32, %arg1 : i32, i32, i32
  }
  func.func @transform_1(%arg0: i32, %arg1: i32) -> (i32, i32) {
    %c0_i32 = arith.constant 0 : i32
    %c0_i32_0 = arith.constant 0 : i32
    %c0_i32_1 = arith.constant 0 : i32
    return %c0_i32, %c0_i32_0 : i32, i32
  }
  func.func @transform_2(%arg0: i32, %arg1: i32) -> (i32, i32) {
    %c0_i32 = arith.constant 0 : i32
    %c0_i32_0 = arith.constant 0 : i32
    %c0_i32_1 = arith.constant 0 : i32
    return %c0_i32, %c0_i32_0 : i32, i32
  }
  func.func @transform_3(%arg0: i32, %arg1: i32) -> (i32, i32) {
    %c0_i32 = arith.constant 0 : i32
    %c0_i32_0 = arith.constant 0 : i32
    %c0_i32_1 = arith.constant 0 : i32
    return %c0_i32, %c0_i32_0 : i32, i32
  }
  func.func @transform_4(%arg0: i32, %arg1: i32) -> (i32, i32) {
    %c0_i32 = arith.constant 0 : i32
    %c0_i32_0 = arith.constant 0 : i32
    %c0_i32_1 = arith.constant 0 : i32
    return %c0_i32, %c0_i32_0 : i32, i32
  }
  func.func @transform_5(%arg0: i32, %arg1: i32) -> (i32, i32, i32) {
    %c0_i32 = arith.constant 0 : i32
    %c0_i32_0 = arith.constant 0 : i32
    return %arg0, %c0_i32, %arg1 : i32, i32, i32
  }
  func.func @transform_6(%arg0: i32, %arg1: i32) -> (i32, i32, i32, i32) {
    %c0_i32 = arith.constant 0 : i32
    %c0_i32_0 = arith.constant 0 : i32
    %c0_i32_1 = arith.constant 0 : i32
    return %arg0, %arg1, %c0_i32, %c0_i32_0 : i32, i32, i32, i32
  }
  func.func @transform_7(%arg0: i32, %arg1: i32) -> (i32, i32, i32, i32) {
    %c0_i32 = arith.constant 0 : i32
    %c0_i32_0 = arith.constant 0 : i32
    %c0_i32_1 = arith.constant 0 : i32
    return %arg0, %arg1, %c0_i32, %c0_i32_0 : i32, i32, i32, i32
  }
}

module attributes {stable_mosaic.version = 11 : i64} {
  func.func @_conv3x3_kernel(%arg0: i32, %arg1: memref<1x4x256xf32, #tpu.memory_space<vmem>>, %arg2: memref<4x1xf32, #tpu.memory_space<vmem>>, %arg3: memref<4x1xf32, #tpu.memory_space<vmem>>, %arg4: memref<9x4x4xf32, #tpu.memory_space<vmem>>, %arg5: memref<4x1xf32, #tpu.memory_space<vmem>>, %arg6: memref<9x1x256xf32, #tpu.memory_space<vmem>>, %arg7: memref<1x4x256xf32, #tpu.memory_space<vmem>>, %arg8: memref<1x4x2xf32, #tpu.memory_space<vmem>>) attributes {dimension_semantics = [#tpu.dimension_semantics<parallel>], iteration_bounds = array<i64: 2>, scalar_prefetch = 0 : i64, scratch_operands = 0 : i64, tpu.core_type = #tpu.core_type<tc>, window_params = [{transform_indices = @transform_0, window_bounds = array<i64: 1, 4, 256>}, {pipeline_mode = #tpu.pipeline_mode<synchronous>, transform_indices = @transform_1, window_bounds = array<i64: 4, 1>}, {pipeline_mode = #tpu.pipeline_mode<synchronous>, transform_indices = @transform_2, window_bounds = array<i64: 4, 1>}, {pipeline_mode = #tpu.pipeline_mode<synchronous>, transform_indices = @transform_3, window_bounds = array<i64: 9, 4, 4>}, {pipeline_mode = #tpu.pipeline_mode<synchronous>, transform_indices = @transform_4, window_bounds = array<i64: 4, 1>}, {pipeline_mode = #tpu.pipeline_mode<synchronous>, transform_indices = @transform_5, window_bounds = array<i64: 9, 1, 256>}, {transform_indices = @transform_6, window_bounds = array<i64: 1, 4, 256>}, {transform_indices = @transform_7, window_bounds = array<i64: 1, 4, 2>}]} {
    %c0 = arith.constant 0 : index
    %c0_0 = arith.constant 0 : index
    %c0_1 = arith.constant 0 : index
    %0 = vector.load %arg1[%c0, %c0_0, %c0_1] : memref<1x4x256xf32, #tpu.memory_space<vmem>>, vector<1x4x256xf32>
    %1 = vector.shape_cast %0 : vector<1x4x256xf32> to vector<4x256xf32>
    %c0_2 = arith.constant 0 : index
    %c0_3 = arith.constant 0 : index
    %2 = vector.load %arg2[%c0_2, %c0_3] : memref<4x1xf32, #tpu.memory_space<vmem>>, vector<4x1xf32>
    %3 = vector.broadcast %2 : vector<4x1xf32> to vector<4x256xf32>
    %4 = arith.mulf %1, %3 : vector<4x256xf32>
    %c0_4 = arith.constant 0 : index
    %c0_5 = arith.constant 0 : index
    %5 = vector.load %arg3[%c0_4, %c0_5] : memref<4x1xf32, #tpu.memory_space<vmem>>, vector<4x1xf32>
    %6 = vector.broadcast %5 : vector<4x1xf32> to vector<4x256xf32>
    %7 = arith.addf %4, %6 : vector<4x256xf32>
    %cst = arith.constant 0.000000e+00 : f32
    %8 = vector.broadcast %cst : f32 to vector<4x256xf32>
    %9 = arith.maximumf %7, %8 : vector<4x256xf32>
    %cst_6 = arith.constant 0.000000e+00 : f32
    %10 = vector.broadcast %cst_6 : f32 to vector<4x256xf32>
    %c17_i32 = arith.constant 17 : i32
    %11 = tpu.dynamic_rotate %9 by %c17_i32 dim 1 : vector<4x256xf32>, i32 -> vector<4x256xf32>
    %c0_7 = arith.constant 0 : index
    %c0_8 = arith.constant 0 : index
    %c0_9 = arith.constant 0 : index
    %12 = vector.load %arg6[%c0_7, %c0_8, %c0_9] : memref<9x1x256xf32, #tpu.memory_space<vmem>>, vector<1x1x256xf32>
    %13 = vector.shape_cast %12 : vector<1x1x256xf32> to vector<1x256xf32>
    %14 = vector.broadcast %13 : vector<1x256xf32> to vector<4x256xf32>
    %15 = arith.mulf %11, %14 : vector<4x256xf32>
    %c0_10 = arith.constant 0 : index
    %c0_11 = arith.constant 0 : index
    %c0_12 = arith.constant 0 : index
    %16 = vector.load %arg4[%c0_10, %c0_11, %c0_12] : memref<9x4x4xf32, #tpu.memory_space<vmem>>, vector<1x4x4xf32>
    %17 = vector.shape_cast %16 : vector<1x4x4xf32> to vector<4x4xf32>
    %cst_13 = arith.constant dense<0.000000e+00> : vector<4x256xf32>
    %18 = tpu.matmul %17, %15, %cst_13 {dimension_numbers = #tpu.dot_dimension_numbers<[1], [0], [0], [1], [0, 0, 1, 1], [], []>} : vector<4x4xf32>, vector<4x256xf32>, vector<4x256xf32> -> vector<4x256xf32>
    %19 = arith.addf %10, %18 : vector<4x256xf32>
    %c16_i32 = arith.constant 16 : i32
    %20 = tpu.dynamic_rotate %9 by %c16_i32 dim 1 : vector<4x256xf32>, i32 -> vector<4x256xf32>
    %c1 = arith.constant 1 : index
    %c0_14 = arith.constant 0 : index
    %c0_15 = arith.constant 0 : index
    %21 = vector.load %arg6[%c1, %c0_14, %c0_15] : memref<9x1x256xf32, #tpu.memory_space<vmem>>, vector<1x1x256xf32>
    %22 = vector.shape_cast %21 : vector<1x1x256xf32> to vector<1x256xf32>
    %23 = vector.broadcast %22 : vector<1x256xf32> to vector<4x256xf32>
    %24 = arith.mulf %20, %23 : vector<4x256xf32>
    %c1_16 = arith.constant 1 : index
    %c0_17 = arith.constant 0 : index
    %c0_18 = arith.constant 0 : index
    %25 = vector.load %arg4[%c1_16, %c0_17, %c0_18] : memref<9x4x4xf32, #tpu.memory_space<vmem>>, vector<1x4x4xf32>
    %26 = vector.shape_cast %25 : vector<1x4x4xf32> to vector<4x4xf32>
    %cst_19 = arith.constant dense<0.000000e+00> : vector<4x256xf32>
    %27 = tpu.matmul %26, %24, %cst_19 {dimension_numbers = #tpu.dot_dimension_numbers<[1], [0], [0], [1], [0, 0, 1, 1], [], []>} : vector<4x4xf32>, vector<4x256xf32>, vector<4x256xf32> -> vector<4x256xf32>
    %28 = arith.addf %19, %27 : vector<4x256xf32>
    %c15_i32 = arith.constant 15 : i32
    %29 = tpu.dynamic_rotate %9 by %c15_i32 dim 1 : vector<4x256xf32>, i32 -> vector<4x256xf32>
    %c2 = arith.constant 2 : index
    %c0_20 = arith.constant 0 : index
    %c0_21 = arith.constant 0 : index
    %30 = vector.load %arg6[%c2, %c0_20, %c0_21] : memref<9x1x256xf32, #tpu.memory_space<vmem>>, vector<1x1x256xf32>
    %31 = vector.shape_cast %30 : vector<1x1x256xf32> to vector<1x256xf32>
    %32 = vector.broadcast %31 : vector<1x256xf32> to vector<4x256xf32>
    %33 = arith.mulf %29, %32 : vector<4x256xf32>
    %c2_22 = arith.constant 2 : index
    %c0_23 = arith.constant 0 : index
    %c0_24 = arith.constant 0 : index
    %34 = vector.load %arg4[%c2_22, %c0_23, %c0_24] : memref<9x4x4xf32, #tpu.memory_space<vmem>>, vector<1x4x4xf32>
    %35 = vector.shape_cast %34 : vector<1x4x4xf32> to vector<4x4xf32>
    %cst_25 = arith.constant dense<0.000000e+00> : vector<4x256xf32>
    %36 = tpu.matmul %35, %33, %cst_25 {dimension_numbers = #tpu.dot_dimension_numbers<[1], [0], [0], [1], [0, 0, 1, 1], [], []>} : vector<4x4xf32>, vector<4x256xf32>, vector<4x256xf32> -> vector<4x256xf32>
    %37 = arith.addf %28, %36 : vector<4x256xf32>
    %c1_i32 = arith.constant 1 : i32
    %38 = tpu.dynamic_rotate %9 by %c1_i32 dim 1 : vector<4x256xf32>, i32 -> vector<4x256xf32>
    %c3 = arith.constant 3 : index
    %c0_26 = arith.constant 0 : index
    %c0_27 = arith.constant 0 : index
    %39 = vector.load %arg6[%c3, %c0_26, %c0_27] : memref<9x1x256xf32, #tpu.memory_space<vmem>>, vector<1x1x256xf32>
    %40 = vector.shape_cast %39 : vector<1x1x256xf32> to vector<1x256xf32>
    %41 = vector.broadcast %40 : vector<1x256xf32> to vector<4x256xf32>
    %42 = arith.mulf %38, %41 : vector<4x256xf32>
    %c3_28 = arith.constant 3 : index
    %c0_29 = arith.constant 0 : index
    %c0_30 = arith.constant 0 : index
    %43 = vector.load %arg4[%c3_28, %c0_29, %c0_30] : memref<9x4x4xf32, #tpu.memory_space<vmem>>, vector<1x4x4xf32>
    %44 = vector.shape_cast %43 : vector<1x4x4xf32> to vector<4x4xf32>
    %cst_31 = arith.constant dense<0.000000e+00> : vector<4x256xf32>
    %45 = tpu.matmul %44, %42, %cst_31 {dimension_numbers = #tpu.dot_dimension_numbers<[1], [0], [0], [1], [0, 0, 1, 1], [], []>} : vector<4x4xf32>, vector<4x256xf32>, vector<4x256xf32> -> vector<4x256xf32>
    %46 = arith.addf %37, %45 : vector<4x256xf32>
    %c4 = arith.constant 4 : index
    %c0_32 = arith.constant 0 : index
    %c0_33 = arith.constant 0 : index
    %47 = vector.load %arg6[%c4, %c0_32, %c0_33] : memref<9x1x256xf32, #tpu.memory_space<vmem>>, vector<1x1x256xf32>
    %48 = vector.shape_cast %47 : vector<1x1x256xf32> to vector<1x256xf32>
    %49 = vector.broadcast %48 : vector<1x256xf32> to vector<4x256xf32>
    %50 = arith.mulf %9, %49 : vector<4x256xf32>
    %c4_34 = arith.constant 4 : index
    %c0_35 = arith.constant 0 : index
    %c0_36 = arith.constant 0 : index
    %51 = vector.load %arg4[%c4_34, %c0_35, %c0_36] : memref<9x4x4xf32, #tpu.memory_space<vmem>>, vector<1x4x4xf32>
    %52 = vector.shape_cast %51 : vector<1x4x4xf32> to vector<4x4xf32>
    %cst_37 = arith.constant dense<0.000000e+00> : vector<4x256xf32>
    %53 = tpu.matmul %52, %50, %cst_37 {dimension_numbers = #tpu.dot_dimension_numbers<[1], [0], [0], [1], [0, 0, 1, 1], [], []>} : vector<4x4xf32>, vector<4x256xf32>, vector<4x256xf32> -> vector<4x256xf32>
    %54 = arith.addf %46, %53 : vector<4x256xf32>
    %c255_i32 = arith.constant 255 : i32
    %55 = tpu.dynamic_rotate %9 by %c255_i32 dim 1 : vector<4x256xf32>, i32 -> vector<4x256xf32>
    %c5 = arith.constant 5 : index
    %c0_38 = arith.constant 0 : index
    %c0_39 = arith.constant 0 : index
    %56 = vector.load %arg6[%c5, %c0_38, %c0_39] : memref<9x1x256xf32, #tpu.memory_space<vmem>>, vector<1x1x256xf32>
    %57 = vector.shape_cast %56 : vector<1x1x256xf32> to vector<1x256xf32>
    %58 = vector.broadcast %57 : vector<1x256xf32> to vector<4x256xf32>
    %59 = arith.mulf %55, %58 : vector<4x256xf32>
    %c5_40 = arith.constant 5 : index
    %c0_41 = arith.constant 0 : index
    %c0_42 = arith.constant 0 : index
    %60 = vector.load %arg4[%c5_40, %c0_41, %c0_42] : memref<9x4x4xf32, #tpu.memory_space<vmem>>, vector<1x4x4xf32>
    %61 = vector.shape_cast %60 : vector<1x4x4xf32> to vector<4x4xf32>
    %cst_43 = arith.constant dense<0.000000e+00> : vector<4x256xf32>
    %62 = tpu.matmul %61, %59, %cst_43 {dimension_numbers = #tpu.dot_dimension_numbers<[1], [0], [0], [1], [0, 0, 1, 1], [], []>} : vector<4x4xf32>, vector<4x256xf32>, vector<4x256xf32> -> vector<4x256xf32>
    %63 = arith.addf %54, %62 : vector<4x256xf32>
    %c241_i32 = arith.constant 241 : i32
    %64 = tpu.dynamic_rotate %9 by %c241_i32 dim 1 : vector<4x256xf32>, i32 -> vector<4x256xf32>
    %c6 = arith.constant 6 : index
    %c0_44 = arith.constant 0 : index
    %c0_45 = arith.constant 0 : index
    %65 = vector.load %arg6[%c6, %c0_44, %c0_45] : memref<9x1x256xf32, #tpu.memory_space<vmem>>, vector<1x1x256xf32>
    %66 = vector.shape_cast %65 : vector<1x1x256xf32> to vector<1x256xf32>
    %67 = vector.broadcast %66 : vector<1x256xf32> to vector<4x256xf32>
    %68 = arith.mulf %64, %67 : vector<4x256xf32>
    %c6_46 = arith.constant 6 : index
    %c0_47 = arith.constant 0 : index
    %c0_48 = arith.constant 0 : index
    %69 = vector.load %arg4[%c6_46, %c0_47, %c0_48] : memref<9x4x4xf32, #tpu.memory_space<vmem>>, vector<1x4x4xf32>
    %70 = vector.shape_cast %69 : vector<1x4x4xf32> to vector<4x4xf32>
    %cst_49 = arith.constant dense<0.000000e+00> : vector<4x256xf32>
    %71 = tpu.matmul %70, %68, %cst_49 {dimension_numbers = #tpu.dot_dimension_numbers<[1], [0], [0], [1], [0, 0, 1, 1], [], []>} : vector<4x4xf32>, vector<4x256xf32>, vector<4x256xf32> -> vector<4x256xf32>
    %72 = arith.addf %63, %71 : vector<4x256xf32>
    %c240_i32 = arith.constant 240 : i32
    %73 = tpu.dynamic_rotate %9 by %c240_i32 dim 1 : vector<4x256xf32>, i32 -> vector<4x256xf32>
    %c7 = arith.constant 7 : index
    %c0_50 = arith.constant 0 : index
    %c0_51 = arith.constant 0 : index
    %74 = vector.load %arg6[%c7, %c0_50, %c0_51] : memref<9x1x256xf32, #tpu.memory_space<vmem>>, vector<1x1x256xf32>
    %75 = vector.shape_cast %74 : vector<1x1x256xf32> to vector<1x256xf32>
    %76 = vector.broadcast %75 : vector<1x256xf32> to vector<4x256xf32>
    %77 = arith.mulf %73, %76 : vector<4x256xf32>
    %c7_52 = arith.constant 7 : index
    %c0_53 = arith.constant 0 : index
    %c0_54 = arith.constant 0 : index
    %78 = vector.load %arg4[%c7_52, %c0_53, %c0_54] : memref<9x4x4xf32, #tpu.memory_space<vmem>>, vector<1x4x4xf32>
    %79 = vector.shape_cast %78 : vector<1x4x4xf32> to vector<4x4xf32>
    %cst_55 = arith.constant dense<0.000000e+00> : vector<4x256xf32>
    %80 = tpu.matmul %79, %77, %cst_55 {dimension_numbers = #tpu.dot_dimension_numbers<[1], [0], [0], [1], [0, 0, 1, 1], [], []>} : vector<4x4xf32>, vector<4x256xf32>, vector<4x256xf32> -> vector<4x256xf32>
    %81 = arith.addf %72, %80 : vector<4x256xf32>
    %c239_i32 = arith.constant 239 : i32
    %82 = tpu.dynamic_rotate %9 by %c239_i32 dim 1 : vector<4x256xf32>, i32 -> vector<4x256xf32>
    %c8 = arith.constant 8 : index
    %c0_56 = arith.constant 0 : index
    %c0_57 = arith.constant 0 : index
    %83 = vector.load %arg6[%c8, %c0_56, %c0_57] : memref<9x1x256xf32, #tpu.memory_space<vmem>>, vector<1x1x256xf32>
    %84 = vector.shape_cast %83 : vector<1x1x256xf32> to vector<1x256xf32>
    %85 = vector.broadcast %84 : vector<1x256xf32> to vector<4x256xf32>
    %86 = arith.mulf %82, %85 : vector<4x256xf32>
    %c8_58 = arith.constant 8 : index
    %c0_59 = arith.constant 0 : index
    %c0_60 = arith.constant 0 : index
    %87 = vector.load %arg4[%c8_58, %c0_59, %c0_60] : memref<9x4x4xf32, #tpu.memory_space<vmem>>, vector<1x4x4xf32>
    %88 = vector.shape_cast %87 : vector<1x4x4xf32> to vector<4x4xf32>
    %cst_61 = arith.constant dense<0.000000e+00> : vector<4x256xf32>
    %89 = tpu.matmul %88, %86, %cst_61 {dimension_numbers = #tpu.dot_dimension_numbers<[1], [0], [0], [1], [0, 0, 1, 1], [], []>} : vector<4x4xf32>, vector<4x256xf32>, vector<4x256xf32> -> vector<4x256xf32>
    %90 = arith.addf %81, %89 : vector<4x256xf32>
    %c0_62 = arith.constant 0 : index
    %c0_63 = arith.constant 0 : index
    %91 = vector.load %arg5[%c0_62, %c0_63] : memref<4x1xf32, #tpu.memory_space<vmem>>, vector<4x1xf32>
    %92 = vector.broadcast %91 : vector<4x1xf32> to vector<4x256xf32>
    %93 = arith.addf %90, %92 : vector<4x256xf32>
    %c0_64 = arith.constant 0 : index
    %c0_65 = arith.constant 0 : index
    %c0_66 = arith.constant 0 : index
    %94 = vector.load %arg7[%c0_64, %c0_65, %c0_66] : memref<1x4x256xf32, #tpu.memory_space<vmem>>, vector<1x4x256xf32>
    %95 = vector.shape_cast %94 : vector<1x4x256xf32> to vector<4x256xf32>
    %96 = vector.shape_cast %93 : vector<4x256xf32> to vector<1x4x256xf32>
    tpu.vector_store %arg7[%c0_64, %c0_65, %c0_66], %96 {strides = array<i32>} : memref<1x4x256xf32, #tpu.memory_space<vmem>>, vector<1x4x256xf32>,
    %cst_67 = arith.constant dense<0.000000e+00> : vector<4xf32>
    %97 = vector.multi_reduction <add>, %93, %cst_67 [1] : vector<4x256xf32> to vector<4xf32>
    %98 = vector.shape_cast %97 : vector<4xf32> to vector<4x1xf32>
    %c0_68 = arith.constant 0 : index
    %c0_69 = arith.constant 0 : index
    %c0_70 = arith.constant 0 : index
    %99 = vector.load %arg8[%c0_68, %c0_69, %c0_70] : memref<1x4x2xf32, #tpu.memory_space<vmem>>, vector<1x4x1xf32>
    %100 = vector.shape_cast %99 : vector<1x4x1xf32> to vector<4x1xf32>
    %101 = vector.shape_cast %98 : vector<4x1xf32> to vector<1x4x1xf32>
    tpu.vector_store %arg8[%c0_68, %c0_69, %c0_70], %101 {strides = array<i32>} : memref<1x4x2xf32, #tpu.memory_space<vmem>>, vector<1x4x1xf32>,
    %102 = arith.mulf %93, %93 : vector<4x256xf32>
    %cst_71 = arith.constant dense<0.000000e+00> : vector<4xf32>
    %103 = vector.multi_reduction <add>, %102, %cst_71 [1] : vector<4x256xf32> to vector<4xf32>
    %104 = vector.shape_cast %103 : vector<4xf32> to vector<4x1xf32>
    %c0_72 = arith.constant 0 : index
    %c0_73 = arith.constant 0 : index
    %c1_74 = arith.constant 1 : index
    %105 = vector.load %arg8[%c0_72, %c0_73, %c1_74] : memref<1x4x2xf32, #tpu.memory_space<vmem>>, vector<1x4x1xf32>
    %106 = vector.shape_cast %105 : vector<1x4x1xf32> to vector<4x1xf32>
    %107 = vector.shape_cast %104 : vector<4x1xf32> to vector<1x4x1xf32>
    tpu.vector_store %arg8[%c0_72, %c0_73, %c1_74], %107 {strides = array<i32>} : memref<1x4x2xf32, #tpu.memory_space<vmem>>, vector<1x4x1xf32>,
    return
  }
  func.func @transform_0(%arg0: i32) -> (i32, i32, i32) {
    %c0_i32 = arith.constant 0 : i32
    %c0_i32_0 = arith.constant 0 : i32
    %c0_i32_1 = arith.constant 0 : i32
    return %arg0, %c0_i32, %c0_i32_0 : i32, i32, i32
  }
  func.func @transform_1(%arg0: i32) -> (i32, i32) {
    %c0_i32 = arith.constant 0 : i32
    %c0_i32_0 = arith.constant 0 : i32
    %c0_i32_1 = arith.constant 0 : i32
    return %c0_i32, %c0_i32_0 : i32, i32
  }
  func.func @transform_2(%arg0: i32) -> (i32, i32) {
    %c0_i32 = arith.constant 0 : i32
    %c0_i32_0 = arith.constant 0 : i32
    %c0_i32_1 = arith.constant 0 : i32
    return %c0_i32, %c0_i32_0 : i32, i32
  }
  func.func @transform_3(%arg0: i32) -> (i32, i32, i32) {
    %c0_i32 = arith.constant 0 : i32
    %c0_i32_0 = arith.constant 0 : i32
    %c0_i32_1 = arith.constant 0 : i32
    %c0_i32_2 = arith.constant 0 : i32
    return %c0_i32, %c0_i32_0, %c0_i32_1 : i32, i32, i32
  }
  func.func @transform_4(%arg0: i32) -> (i32, i32) {
    %c0_i32 = arith.constant 0 : i32
    %c0_i32_0 = arith.constant 0 : i32
    %c0_i32_1 = arith.constant 0 : i32
    return %c0_i32, %c0_i32_0 : i32, i32
  }
  func.func @transform_5(%arg0: i32) -> (i32, i32, i32) {
    %c0_i32 = arith.constant 0 : i32
    %c0_i32_0 = arith.constant 0 : i32
    %c0_i32_1 = arith.constant 0 : i32
    %c0_i32_2 = arith.constant 0 : i32
    return %c0_i32, %c0_i32_0, %c0_i32_1 : i32, i32, i32
  }
  func.func @transform_6(%arg0: i32) -> (i32, i32, i32) {
    %c0_i32 = arith.constant 0 : i32
    %c0_i32_0 = arith.constant 0 : i32
    %c0_i32_1 = arith.constant 0 : i32
    return %arg0, %c0_i32, %c0_i32_0 : i32, i32, i32
  }
  func.func @transform_7(%arg0: i32) -> (i32, i32, i32) {
    %c0_i32 = arith.constant 0 : i32
    %c0_i32_0 = arith.constant 0 : i32
    %c0_i32_1 = arith.constant 0 : i32
    return %arg0, %c0_i32, %c0_i32_0 : i32, i32, i32
  }
}

module attributes {stable_mosaic.version = 11 : i64} {
  func.func @_conv3_stats_kernel(%arg0: i32, %arg1: i32, %arg2: memref<1x4x256xf32, #tpu.memory_space<vmem>>, %arg3: memref<4x1xf32, #tpu.memory_space<vmem>>, %arg4: memref<4x1xf32, #tpu.memory_space<vmem>>, %arg5: memref<8x4xf32, #tpu.memory_space<vmem>>, %arg6: memref<8x1xf32, #tpu.memory_space<vmem>>, %arg7: memref<1x1x8x2xf32, #tpu.memory_space<vmem>>) attributes {dimension_semantics = [#tpu.dimension_semantics<parallel>, #tpu.dimension_semantics<parallel>], iteration_bounds = array<i64: 2, 1>, scalar_prefetch = 0 : i64, scratch_operands = 0 : i64, tpu.core_type = #tpu.core_type<tc>, window_params = [{transform_indices = @transform_0, window_bounds = array<i64: 1, 4, 256>}, {pipeline_mode = #tpu.pipeline_mode<synchronous>, transform_indices = @transform_1, window_bounds = array<i64: 4, 1>}, {pipeline_mode = #tpu.pipeline_mode<synchronous>, transform_indices = @transform_2, window_bounds = array<i64: 4, 1>}, {pipeline_mode = #tpu.pipeline_mode<synchronous>, transform_indices = @transform_3, window_bounds = array<i64: 8, 4>}, {pipeline_mode = #tpu.pipeline_mode<synchronous>, transform_indices = @transform_4, window_bounds = array<i64: 8, 1>}, {transform_indices = @transform_5, window_bounds = array<i64: 1, 1, 8, 2>}]} {
    %c0 = arith.constant 0 : index
    %c0_0 = arith.constant 0 : index
    %c0_1 = arith.constant 0 : index
    %0 = vector.load %arg2[%c0, %c0_0, %c0_1] : memref<1x4x256xf32, #tpu.memory_space<vmem>>, vector<1x4x256xf32>
    %1 = vector.shape_cast %0 : vector<1x4x256xf32> to vector<4x256xf32>
    %c0_2 = arith.constant 0 : index
    %c0_3 = arith.constant 0 : index
    %2 = vector.load %arg3[%c0_2, %c0_3] : memref<4x1xf32, #tpu.memory_space<vmem>>, vector<4x1xf32>
    %3 = vector.broadcast %2 : vector<4x1xf32> to vector<4x256xf32>
    %4 = arith.mulf %1, %3 : vector<4x256xf32>
    %c0_4 = arith.constant 0 : index
    %c0_5 = arith.constant 0 : index
    %5 = vector.load %arg4[%c0_4, %c0_5] : memref<4x1xf32, #tpu.memory_space<vmem>>, vector<4x1xf32>
    %6 = vector.broadcast %5 : vector<4x1xf32> to vector<4x256xf32>
    %7 = arith.addf %4, %6 : vector<4x256xf32>
    %cst = arith.constant 0.000000e+00 : f32
    %8 = vector.broadcast %cst : f32 to vector<4x256xf32>
    %9 = arith.maximumf %7, %8 : vector<4x256xf32>
    %c0_6 = arith.constant 0 : index
    %c0_7 = arith.constant 0 : index
    %10 = vector.load %arg5[%c0_6, %c0_7] : memref<8x4xf32, #tpu.memory_space<vmem>>, vector<8x4xf32>
    %cst_8 = arith.constant dense<0.000000e+00> : vector<8x256xf32>
    %11 = tpu.matmul %10, %9, %cst_8 {dimension_numbers = #tpu.dot_dimension_numbers<[1], [0], [0], [1], [0, 0, 1, 1], [], []>} : vector<8x4xf32>, vector<4x256xf32>, vector<8x256xf32> -> vector<8x256xf32>
    %c0_9 = arith.constant 0 : index
    %c0_10 = arith.constant 0 : index
    %12 = vector.load %arg6[%c0_9, %c0_10] : memref<8x1xf32, #tpu.memory_space<vmem>>, vector<8x1xf32>
    %13 = vector.broadcast %12 : vector<8x1xf32> to vector<8x256xf32>
    %14 = arith.addf %11, %13 : vector<8x256xf32>
    %cst_11 = arith.constant dense<0.000000e+00> : vector<8xf32>
    %15 = vector.multi_reduction <add>, %14, %cst_11 [1] : vector<8x256xf32> to vector<8xf32>
    %16 = vector.shape_cast %15 : vector<8xf32> to vector<8x1xf32>
    %c0_12 = arith.constant 0 : index
    %c0_13 = arith.constant 0 : index
    %c0_14 = arith.constant 0 : index
    %c0_15 = arith.constant 0 : index
    %17 = vector.load %arg7[%c0_12, %c0_13, %c0_14, %c0_15] : memref<1x1x8x2xf32, #tpu.memory_space<vmem>>, vector<1x1x8x1xf32>
    %18 = vector.shape_cast %17 : vector<1x1x8x1xf32> to vector<8x1xf32>
    %19 = vector.shape_cast %16 : vector<8x1xf32> to vector<1x1x8x1xf32>
    tpu.vector_store %arg7[%c0_12, %c0_13, %c0_14, %c0_15], %19 {strides = array<i32>} : memref<1x1x8x2xf32, #tpu.memory_space<vmem>>, vector<1x1x8x1xf32>,
    %20 = arith.mulf %14, %14 : vector<8x256xf32>
    %cst_16 = arith.constant dense<0.000000e+00> : vector<8xf32>
    %21 = vector.multi_reduction <add>, %20, %cst_16 [1] : vector<8x256xf32> to vector<8xf32>
    %22 = vector.shape_cast %21 : vector<8xf32> to vector<8x1xf32>
    %c0_17 = arith.constant 0 : index
    %c0_18 = arith.constant 0 : index
    %c0_19 = arith.constant 0 : index
    %c1 = arith.constant 1 : index
    %23 = vector.load %arg7[%c0_17, %c0_18, %c0_19, %c1] : memref<1x1x8x2xf32, #tpu.memory_space<vmem>>, vector<1x1x8x1xf32>
    %24 = vector.shape_cast %23 : vector<1x1x8x1xf32> to vector<8x1xf32>
    %25 = vector.shape_cast %22 : vector<8x1xf32> to vector<1x1x8x1xf32>
    tpu.vector_store %arg7[%c0_17, %c0_18, %c0_19, %c1], %25 {strides = array<i32>} : memref<1x1x8x2xf32, #tpu.memory_space<vmem>>, vector<1x1x8x1xf32>,
    return
  }
  func.func @transform_0(%arg0: i32, %arg1: i32) -> (i32, i32, i32) {
    %c0_i32 = arith.constant 0 : i32
    %c0_i32_0 = arith.constant 0 : i32
    return %arg0, %c0_i32, %arg1 : i32, i32, i32
  }
  func.func @transform_1(%arg0: i32, %arg1: i32) -> (i32, i32) {
    %c0_i32 = arith.constant 0 : i32
    %c0_i32_0 = arith.constant 0 : i32
    %c0_i32_1 = arith.constant 0 : i32
    return %c0_i32, %c0_i32_0 : i32, i32
  }
  func.func @transform_2(%arg0: i32, %arg1: i32) -> (i32, i32) {
    %c0_i32 = arith.constant 0 : i32
    %c0_i32_0 = arith.constant 0 : i32
    %c0_i32_1 = arith.constant 0 : i32
    return %c0_i32, %c0_i32_0 : i32, i32
  }
  func.func @transform_3(%arg0: i32, %arg1: i32) -> (i32, i32) {
    %c0_i32 = arith.constant 0 : i32
    %c0_i32_0 = arith.constant 0 : i32
    %c0_i32_1 = arith.constant 0 : i32
    return %c0_i32, %c0_i32_0 : i32, i32
  }
  func.func @transform_4(%arg0: i32, %arg1: i32) -> (i32, i32) {
    %c0_i32 = arith.constant 0 : i32
    %c0_i32_0 = arith.constant 0 : i32
    %c0_i32_1 = arith.constant 0 : i32
    return %c0_i32, %c0_i32_0 : i32, i32
  }
  func.func @transform_5(%arg0: i32, %arg1: i32) -> (i32, i32, i32, i32) {
    %c0_i32 = arith.constant 0 : i32
    %c0_i32_0 = arith.constant 0 : i32
    %c0_i32_1 = arith.constant 0 : i32
    return %arg0, %arg1, %c0_i32, %c0_i32_0 : i32, i32, i32, i32
  }
}

module attributes {stable_mosaic.version = 11 : i64} {
  func.func @_final_skip_kernel(%arg0: i32, %arg1: i32, %arg2: memref<1x4x256xf32, #tpu.memory_space<vmem>>, %arg3: memref<1x4x256xf32, #tpu.memory_space<vmem>>, %arg4: memref<4x1xf32, #tpu.memory_space<vmem>>, %arg5: memref<4x1xf32, #tpu.memory_space<vmem>>, %arg6: memref<8x4xf32, #tpu.memory_space<vmem>>, %arg7: memref<8x1xf32, #tpu.memory_space<vmem>>, %arg8: memref<8x1xf32, #tpu.memory_space<vmem>>, %arg9: memref<8x1xf32, #tpu.memory_space<vmem>>, %arg10: memref<8x4xf32, #tpu.memory_space<vmem>>, %arg11: memref<8x1xf32, #tpu.memory_space<vmem>>, %arg12: memref<8x1xf32, #tpu.memory_space<vmem>>, %arg13: memref<8x1xf32, #tpu.memory_space<vmem>>, %arg14: memref<1x8x256xf32, #tpu.memory_space<vmem>>) attributes {dimension_semantics = [#tpu.dimension_semantics<parallel>, #tpu.dimension_semantics<parallel>], iteration_bounds = array<i64: 2, 1>, scalar_prefetch = 0 : i64, scratch_operands = 0 : i64, tpu.core_type = #tpu.core_type<tc>, window_params = [{transform_indices = @transform_0, window_bounds = array<i64: 1, 4, 256>}, {transform_indices = @transform_1, window_bounds = array<i64: 1, 4, 256>}, {pipeline_mode = #tpu.pipeline_mode<synchronous>, transform_indices = @transform_2, window_bounds = array<i64: 4, 1>}, {pipeline_mode = #tpu.pipeline_mode<synchronous>, transform_indices = @transform_3, window_bounds = array<i64: 4, 1>}, {pipeline_mode = #tpu.pipeline_mode<synchronous>, transform_indices = @transform_4, window_bounds = array<i64: 8, 4>}, {pipeline_mode = #tpu.pipeline_mode<synchronous>, transform_indices = @transform_5, window_bounds = array<i64: 8, 1>}, {pipeline_mode = #tpu.pipeline_mode<synchronous>, transform_indices = @transform_6, window_bounds = array<i64: 8, 1>}, {pipeline_mode = #tpu.pipeline_mode<synchronous>, transform_indices = @transform_7, window_bounds = array<i64: 8, 1>}, {pipeline_mode = #tpu.pipeline_mode<synchronous>, transform_indices = @transform_8, window_bounds = array<i64: 8, 4>}, {pipeline_mode = #tpu.pipeline_mode<synchronous>, transform_indices = @transform_9, window_bounds = array<i64: 8, 1>}, {pipeline_mode = #tpu.pipeline_mode<synchronous>, transform_indices = @transform_10, window_bounds = array<i64: 8, 1>}, {pipeline_mode = #tpu.pipeline_mode<synchronous>, transform_indices = @transform_11, window_bounds = array<i64: 8, 1>}, {transform_indices = @transform_12, window_bounds = array<i64: 1, 8, 256>}]} {
    %c0 = arith.constant 0 : index
    %c0_0 = arith.constant 0 : index
    %c0_1 = arith.constant 0 : index
    %0 = vector.load %arg2[%c0, %c0_0, %c0_1] : memref<1x4x256xf32, #tpu.memory_space<vmem>>, vector<1x4x256xf32>
    %1 = vector.shape_cast %0 : vector<1x4x256xf32> to vector<4x256xf32>
    %c0_2 = arith.constant 0 : index
    %c0_3 = arith.constant 0 : index
    %2 = vector.load %arg4[%c0_2, %c0_3] : memref<4x1xf32, #tpu.memory_space<vmem>>, vector<4x1xf32>
    %3 = vector.broadcast %2 : vector<4x1xf32> to vector<4x256xf32>
    %4 = arith.mulf %1, %3 : vector<4x256xf32>
    %c0_4 = arith.constant 0 : index
    %c0_5 = arith.constant 0 : index
    %5 = vector.load %arg5[%c0_4, %c0_5] : memref<4x1xf32, #tpu.memory_space<vmem>>, vector<4x1xf32>
    %6 = vector.broadcast %5 : vector<4x1xf32> to vector<4x256xf32>
    %7 = arith.addf %4, %6 : vector<4x256xf32>
    %cst = arith.constant 0.000000e+00 : f32
    %8 = vector.broadcast %cst : f32 to vector<4x256xf32>
    %9 = arith.maximumf %7, %8 : vector<4x256xf32>
    %c0_6 = arith.constant 0 : index
    %c0_7 = arith.constant 0 : index
    %10 = vector.load %arg6[%c0_6, %c0_7] : memref<8x4xf32, #tpu.memory_space<vmem>>, vector<8x4xf32>
    %cst_8 = arith.constant dense<0.000000e+00> : vector<8x256xf32>
    %11 = tpu.matmul %10, %9, %cst_8 {dimension_numbers = #tpu.dot_dimension_numbers<[1], [0], [0], [1], [0, 0, 1, 1], [], []>} : vector<8x4xf32>, vector<4x256xf32>, vector<8x256xf32> -> vector<8x256xf32>
    %c0_9 = arith.constant 0 : index
    %c0_10 = arith.constant 0 : index
    %12 = vector.load %arg7[%c0_9, %c0_10] : memref<8x1xf32, #tpu.memory_space<vmem>>, vector<8x1xf32>
    %13 = vector.broadcast %12 : vector<8x1xf32> to vector<8x256xf32>
    %14 = arith.addf %11, %13 : vector<8x256xf32>
    %c0_11 = arith.constant 0 : index
    %c0_12 = arith.constant 0 : index
    %15 = vector.load %arg8[%c0_11, %c0_12] : memref<8x1xf32, #tpu.memory_space<vmem>>, vector<8x1xf32>
    %16 = vector.broadcast %15 : vector<8x1xf32> to vector<8x256xf32>
    %17 = arith.mulf %14, %16 : vector<8x256xf32>
    %c0_13 = arith.constant 0 : index
    %c0_14 = arith.constant 0 : index
    %18 = vector.load %arg9[%c0_13, %c0_14] : memref<8x1xf32, #tpu.memory_space<vmem>>, vector<8x1xf32>
    %19 = vector.broadcast %18 : vector<8x1xf32> to vector<8x256xf32>
    %20 = arith.addf %17, %19 : vector<8x256xf32>
    %c0_15 = arith.constant 0 : index
    %c0_16 = arith.constant 0 : index
    %21 = vector.load %arg10[%c0_15, %c0_16] : memref<8x4xf32, #tpu.memory_space<vmem>>, vector<8x4xf32>
    %c0_17 = arith.constant 0 : index
    %c0_18 = arith.constant 0 : index
    %c0_19 = arith.constant 0 : index
    %22 = vector.load %arg3[%c0_17, %c0_18, %c0_19] : memref<1x4x256xf32, #tpu.memory_space<vmem>>, vector<1x4x256xf32>
    %23 = vector.shape_cast %22 : vector<1x4x256xf32> to vector<4x256xf32>
    %cst_20 = arith.constant dense<0.000000e+00> : vector<8x256xf32>
    %24 = tpu.matmul %21, %23, %cst_20 {dimension_numbers = #tpu.dot_dimension_numbers<[1], [0], [0], [1], [0, 0, 1, 1], [], []>} : vector<8x4xf32>, vector<4x256xf32>, vector<8x256xf32> -> vector<8x256xf32>
    %c0_21 = arith.constant 0 : index
    %c0_22 = arith.constant 0 : index
    %25 = vector.load %arg11[%c0_21, %c0_22] : memref<8x1xf32, #tpu.memory_space<vmem>>, vector<8x1xf32>
    %26 = vector.broadcast %25 : vector<8x1xf32> to vector<8x256xf32>
    %27 = arith.addf %24, %26 : vector<8x256xf32>
    %c0_23 = arith.constant 0 : index
    %c0_24 = arith.constant 0 : index
    %28 = vector.load %arg12[%c0_23, %c0_24] : memref<8x1xf32, #tpu.memory_space<vmem>>, vector<8x1xf32>
    %29 = vector.broadcast %28 : vector<8x1xf32> to vector<8x256xf32>
    %30 = arith.mulf %27, %29 : vector<8x256xf32>
    %31 = arith.addf %20, %30 : vector<8x256xf32>
    %c0_25 = arith.constant 0 : index
    %c0_26 = arith.constant 0 : index
    %32 = vector.load %arg13[%c0_25, %c0_26] : memref<8x1xf32, #tpu.memory_space<vmem>>, vector<8x1xf32>
    %33 = vector.broadcast %32 : vector<8x1xf32> to vector<8x256xf32>
    %34 = arith.addf %31, %33 : vector<8x256xf32>
    %c0_27 = arith.constant 0 : index
    %c0_28 = arith.constant 0 : index
    %c0_29 = arith.constant 0 : index
    %35 = vector.load %arg14[%c0_27, %c0_28, %c0_29] : memref<1x8x256xf32, #tpu.memory_space<vmem>>, vector<1x8x256xf32>
    %36 = vector.shape_cast %35 : vector<1x8x256xf32> to vector<8x256xf32>
    %37 = vector.shape_cast %34 : vector<8x256xf32> to vector<1x8x256xf32>
    tpu.vector_store %arg14[%c0_27, %c0_28, %c0_29], %37 {strides = array<i32>} : memref<1x8x256xf32, #tpu.memory_space<vmem>>, vector<1x8x256xf32>,
    return
  }
  func.func @transform_0(%arg0: i32, %arg1: i32) -> (i32, i32, i32) {
    %c0_i32 = arith.constant 0 : i32
    %c0_i32_0 = arith.constant 0 : i32
    return %arg0, %c0_i32, %arg1 : i32, i32, i32
  }
  func.func @transform_1(%arg0: i32, %arg1: i32) -> (i32, i32, i32) {
    %c0_i32 = arith.constant 0 : i32
    %c0_i32_0 = arith.constant 0 : i32
    return %arg0, %c0_i32, %arg1 : i32, i32, i32
  }
  func.func @transform_2(%arg0: i32, %arg1: i32) -> (i32, i32) {
    %c0_i32 = arith.constant 0 : i32
    %c0_i32_0 = arith.constant 0 : i32
    %c0_i32_1 = arith.constant 0 : i32
    return %c0_i32, %c0_i32_0 : i32, i32
  }
  func.func @transform_3(%arg0: i32, %arg1: i32) -> (i32, i32) {
    %c0_i32 = arith.constant 0 : i32
    %c0_i32_0 = arith.constant 0 : i32
    %c0_i32_1 = arith.constant 0 : i32
    return %c0_i32, %c0_i32_0 : i32, i32
  }
  func.func @transform_4(%arg0: i32, %arg1: i32) -> (i32, i32) {
    %c0_i32 = arith.constant 0 : i32
    %c0_i32_0 = arith.constant 0 : i32
    %c0_i32_1 = arith.constant 0 : i32
    return %c0_i32, %c0_i32_0 : i32, i32
  }
  func.func @transform_5(%arg0: i32, %arg1: i32) -> (i32, i32) {
    %c0_i32 = arith.constant 0 : i32
    %c0_i32_0 = arith.constant 0 : i32
    %c0_i32_1 = arith.constant 0 : i32
    return %c0_i32, %c0_i32_0 : i32, i32
  }
  func.func @transform_6(%arg0: i32, %arg1: i32) -> (i32, i32) {
    %c0_i32 = arith.constant 0 : i32
    %c0_i32_0 = arith.constant 0 : i32
    %c0_i32_1 = arith.constant 0 : i32
    return %c0_i32, %c0_i32_0 : i32, i32
  }
  func.func @transform_7(%arg0: i32, %arg1: i32) -> (i32, i32) {
    %c0_i32 = arith.constant 0 : i32
    %c0_i32_0 = arith.constant 0 : i32
    %c0_i32_1 = arith.constant 0 : i32
    return %c0_i32, %c0_i32_0 : i32, i32
  }
  func.func @transform_8(%arg0: i32, %arg1: i32) -> (i32, i32) {
    %c0_i32 = arith.constant 0 : i32
    %c0_i32_0 = arith.constant 0 : i32
    %c0_i32_1 = arith.constant 0 : i32
    return %c0_i32, %c0_i32_0 : i32, i32
  }
  func.func @transform_9(%arg0: i32, %arg1: i32) -> (i32, i32) {
    %c0_i32 = arith.constant 0 : i32
    %c0_i32_0 = arith.constant 0 : i32
    %c0_i32_1 = arith.constant 0 : i32
    return %c0_i32, %c0_i32_0 : i32, i32
  }
  func.func @transform_10(%arg0: i32, %arg1: i32) -> (i32, i32) {
    %c0_i32 = arith.constant 0 : i32
    %c0_i32_0 = arith.constant 0 : i32
    %c0_i32_1 = arith.constant 0 : i32
    return %c0_i32, %c0_i32_0 : i32, i32
  }
  func.func @transform_11(%arg0: i32, %arg1: i32) -> (i32, i32) {
    %c0_i32 = arith.constant 0 : i32
    %c0_i32_0 = arith.constant 0 : i32
    %c0_i32_1 = arith.constant 0 : i32
    return %c0_i32, %c0_i32_0 : i32, i32
  }
  func.func @transform_12(%arg0: i32, %arg1: i32) -> (i32, i32, i32) {
    %c0_i32 = arith.constant 0 : i32
    %c0_i32_0 = arith.constant 0 : i32
    return %arg0, %c0_i32, %arg1 : i32, i32, i32
  }
}

</mosaic_0001>

<bundles_post_ra>
// kernel: hourglass_residual.4
= control target key start
LH: loop header
LB: loop body
LE: loop exit
PB: predicated region body
PF: predicated region fallthrough
CT: control target
= control target key end

     0   :  { %s843_s24 = smov 0   ;;  %s845_s25 = smov 0   ;;  %s911_s0 = inlined_call_operand.vmem [shape: f32[2,4,256], index: 0, kind: input, shape index: {}]   ;;  %s912_s1 = inlined_call_operand.vmem [shape: f32[4,4], index: 1, kind: input, shape index: {}]   ;;  %s913_s2 = inlined_call_operand.vmem [shape: f32[4,1], index: 2, kind: input, shape index: {}]   ;;  %s914_s3 = inlined_call_operand.vmem [shape: f32[8,4], index: 3, kind: input, shape index: {}]   ;;  %s915_s4 = inlined_call_operand.vmem [shape: f32[8,1], index: 4, kind: input, shape index: {}]   ;;  %s916_s5 = inlined_call_operand.vmem [shape: f32[2,4,256], index: 5, kind: output, shape index: {0}]   ;;  %s917_s6 = inlined_call_operand.vmem [shape: f32[2,1,4,2], index: 6, kind: output, shape index: {1}]   ;;  %s918_s7 = inlined_call_operand.vmem [shape: f32[2,1,8,2], index: 7, kind: output, shape index: {2}]  }
   0x1   :  { %s847_s26 = smov 0  }
   0x2 LB: > { %s30_s27 = sadd.s32 1, %s795_s25  ;;  %p732_p0 = scmp.ge.s32.totalorder %s799_s26, 1  ;;  %s799_s26 = sphi %s847_s26, %s18_s26   ;;  %s795_s25 = sphi %s845_s25, %s920_s25   ;;  %s791_s24 = sphi %s843_s24, %s919_s24  }
   0x3   : > { %p32_p1 = scmp.ge.s32.totalorder %s30_s27, 2  ;;  %p267_p2 = scmp.lt.s32.totalorder %s799_s26, 3 }
   0x5   : > { %s922_s27 = smov (%p32_p1, %s30_s27), 0  ;;  %p268_p3 = pnand %p732_p0, %p267_p2 }
   0x6   : > { %p322_p4 = scmp.lt.s32.totalorder (!%p268_p3), %s791_s24, 1  ;;  %v801_v0 = vmov (!%p268_p3), 0.0   ;;  %v357_v1 = vld [vmem:[%s913_s2] sm:$0xf] (!%p268_p3)  ;;  %v802_v2 = vmov (!%p268_p3), 0   ;;  %vm369_vm0 = vcmask (!%p268_p3), 1043456  }
   0x7   : > { %271 = sbr.rel (%p268_p3) target bundleno = 390 (0x186), region = 40  ;;  %438 = vmatprep.mubr.f32.mxu0 (!%p268_p3), %v801_v0  ;;  %540 = vmatprep.mubr.f32.mxu1 (!%p268_p3), %v801_v0  ;;  %v467_v3 = vld [vmem:[%s915_s4] sm:$0xff] (!%p268_p3)  ;;  %vm365_vm1 = vcmask (!%p268_p3), 31744   ;;  %vm550_vm2 = vcmask (!%p268_p3), 7168   ;;  %vm455_vm3 = vcmask (!%p268_p3), 3072   ;;  %vm464_vm4 = vcmask (!%p268_p3), 11272  }
   0x8   : > { %775 = vset.pattern.permute.xlu0 (!%p268_p3), %v802_v2  ;;  %v356_v6 = vld [vmem:[%s912_s1] sm:$0xf] (!%p268_p3)  ;;  %vm557_vm5 = vcmask (!%p268_p3), 15368  }
   0x9   : > { %360 = vperm.xlu0 (!%p268_p3), %775, %v357_v1   ;;  %v466_v7 = vld [vmem:[%s914_s3] sm:$0xff] (!%p268_p3) }
   0xd   : > { %470 = vperm.xlu0 (!%p268_p3), %775, %v467_v3  }
   0xe   : > { %s924_s24 = smov (!%p322_p4, %s791_s24), 1 }
   0xf   : > { %s867_s30 = sshll.u32 %s924_s24, 3  ;;  %s737_s23 = sshll.u32 %s924_s24, 2 }
  0x10   : > { %s329_s12 = scalar_lea.vmem %s911_s0, %s867_s30  ;;  %s339_s19 = scalar_lea.vmem %s916_s5, %s867_s30 }
  0x11   : > { %v355_v4 = vld [vmem:[%s329_s12] sm:$0xff]  ;;  %s354_s22 = scalar_lea.vmem %s918_s7, %s867_s30  ;;  %s347_s8 = scalar_lea.vmem %s917_s6, %s737_s23 }
  0x12   : > { %v364_v5 = vcombine.high %v355_v4, %v355_v4 }
  0x14   : > { %739 = vmatprep.subr.msk.mxu0 %vm369_vm0, %v364_v5  ;;  %742 = vmatprep.subr.msk.mxu1 %vm369_vm0, %v364_v5 }
  0x15   : > { %740 = vmatpush1.msk.msra.mxu0 %vm369_vm0, %v355_v4  ;;  %743 = vmatpush1.msk.msra.mxu1 %vm369_vm0, %v355_v4 }
  0x16   : > { %741 = vmatmul.mubr.msk.f32.vlgmr.msra.gmra.mrb[0].mxu0 %vm365_vm1, %v356_v6  ;;  %744 = vmatmul.mubr.msk.f32.vlgmr.msra.gmra.mrb[0].mxu1 %vm365_vm1, %v466_v7 }
  0x88   : > { %v361_v8 = vpop.permute.xlu0 %360 }
  0x8c   : > { %v471_v9 = vpop.permute.xlu0 %470 }
  0xe9   : > { %v440_v10 = vpop.f32.mrb[0].mxu0  ;;  %v542_v11 = vpop.f32.mrb[0].mxu1 }
  0xea   : > { %v441_v12 = vadd.f32 %v440_v10, %v361_v8  ;;  %v543_v13 = vadd.f32 %v542_v11, %v471_v9  ;;  %v442_v14 = vpop.f32.mrb[1].mxu0  ;;  %v544_v15 = vpop.f32.mrb[1].mxu1 }
  0xeb   : > { %v443_v16 = vadd.f32 %v442_v14, %v361_v8  ;;  %v545_v17 = vadd.f32 %v544_v15, %v471_v9 }
  0xec   : > { %v552_v18 = vmul.f32 %v543_v13, %v543_v13  ;;  %v457_v19 = vmul.f32 %v441_v12, %v441_v12  ;;  %v450_v20 = vsel %vm369_vm0, %v441_v12, 0.0 }
  0xed   : > { %v447_v21 = vcombine.low %v441_v12, %v443_v16  ;;  %v553_v22 = vmul.f32 %v545_v17, %v545_v17  ;;  %v547_v23 = vadd.f32 %v545_v17, %v543_v13  ;;  %v458_v24 = vmul.f32 %v443_v16, %v443_v16 }
  0xee   : > { %v459_v25 = vsel %vm369_vm0, %v457_v19, 0.0  ;;  %v451_v26 = vsel %vm369_vm0, %v443_v16, 0.0 }
  0xef   : > { %449 = vst [vmem:[%s339_s19] sm:$0xff] %v447_v21  ;;  %548 = vadd.xlane.f32.xlu1 %v547_v23  ;;  %v460_v27 = vsel %vm369_vm0, %v458_v24, 0.0  ;;  %v452_v28 = vadd.f32 %v451_v26, %v450_v20  ;;  %v554_v29 = vadd.f32 %v553_v22, %v552_v18 }
  0xf0   : > { %v461_v30 = vadd.f32 %v460_v27, %v459_v25 }
  0xf2   : > { %462 = vadd.xlane.f32.xlu0 %v461_v30 }
  0xf3   : > { %453 = vadd.xlane.f32.xlu1 %v452_v28 }
  0xf7   : > { %555 = vadd.xlane.f32.xlu1 %v554_v29 }
 0x17c   : > { %v549_v31 = vpop.xlane.xlu1 %548 }
 0x17d   : > { %551 = vst.msk [vmem:[%s354_s22] sm:$0xff] %vm550_vm2, %v549_v31 }
 0x17f   : > { %v463_v33 = vpop.xlane.xlu0 %462 }
 0x180   : > { %v454_v32 = vpop.xlane.xlu1 %453 }
 0x181   : > { %456 = vst.msk [vmem:[%s347_s8] sm:$0xf] %vm455_vm3, %v454_v32 }
 0x182   : > { %465 = vst.msk [vmem:[%s347_s8] sm:$0xf] %vm464_vm4, %v463_v33 }
 0x184   : > { %v556_v34 = vpop.xlane.xlu1 %555 }
 0x185   : > { %558 = vst.msk [vmem:[%s354_s22] sm:$0xff] %vm557_vm5, %v556_v34 }
 0x186 PF: > { %s18_s26 = sadd.s32 1, %s799_s26   ;;  %s919_s24 = smov %s795_s25 }
 0x187   : > { %p15_p5 = scmp.ge.s32.totalorder %s18_s26, 4   ;;  %s920_s25 = smov %s922_s27 }
 0x189   :  { %17 = sbr.rel (!%p15_p5) target bundleno = 2 (0x2), region = 94 }

// kernel: hourglass_residual.6
= control target key start
LH: loop header
LB: loop body
LE: loop exit
PB: predicated region body
PF: predicated region fallthrough
CT: control target
= control target key end

     0   :  { %s567_s18 = smov 0   ;;  %s569_s19 = smov 0   ;;  %s619_s0 = inlined_call_operand.vmem [shape: f32[2,4,256], index: 0, kind: input, shape index: {}]   ;;  %s620_s1 = inlined_call_operand.vmem [shape: f32[4,1], index: 1, kind: input, shape index: {}]   ;;  %s621_s2 = inlined_call_operand.vmem [shape: f32[4,1], index: 2, kind: input, shape index: {}]   ;;  %s622_s3 = inlined_call_operand.vmem [shape: f32[8,4], index: 3, kind: input, shape index: {}]   ;;  %s623_s4 = inlined_call_operand.vmem [shape: f32[8,1], index: 4, kind: input, shape index: {}]   ;;  %s624_s5 = inlined_call_operand.vmem [shape: f32[2,1,8,2], index: 5, kind: output, shape index: {}]  }
   0x1   :  { %s571_s20 = smov 0  }
   0x2 LB: > { %s27_s21 = sadd.s32 1, %s528_s19  ;;  %p471_p0 = scmp.ge.s32.totalorder %s532_s20, 1  ;;  %s532_s20 = sphi %s571_s20, %s15_s20   ;;  %s528_s19 = sphi %s569_s19, %s626_s19   ;;  %s524_s18 = sphi %s567_s18, %s625_s18  }
   0x3   : > { %p29_p1 = scmp.ge.s32.totalorder %s27_s21, 2  ;;  %p208_p2 = scmp.lt.s32.totalorder %s532_s20, 3 }
   0x5   : > { %s628_s21 = smov (%p29_p1, %s27_s21), 0  ;;  %p209_p3 = pnand %p471_p0, %p208_p2 }
   0x6   : > { %v260_v0 = vld [vmem:[%s620_s1] sm:$0xf] (!%p209_p3)  ;;  %v534_v1 = vmov (!%p209_p3), 0   ;;  %v535_v3 = vmov (!%p209_p3), 0.0   ;;  %p243_p4 = scmp.lt.s32.totalorder (!%p209_p3), %s524_s18, 1  ;;  %v268_v7 = vlaneseq (!%p209_p3)  ;;  %vm302_vm0 = vcmask (!%p209_p3), 1043456  }
   0x7   : > { %212 = sbr.rel (%p209_p3) target bundleno = 512 (0x200), region = 40  ;;  %508 = vset.pattern.permute.xlu0 (!%p209_p3), %v534_v1  ;;  %509 = vset.pattern.permute.xlu1 (!%p209_p3), %v534_v1  ;;  %v274_v2 = vld [vmem:[%s621_s2] sm:$0xf] (!%p209_p3)  ;;  %v536_v5 = vmov (!%p209_p3), 839922192   ;;  %vm298_vm1 = vcmask (!%p209_p3), 31744  }
   0x8   : > { %263 = vperm.xlu0 (!%p209_p3), %508, %v260_v0   ;;  %371 = vmatprep.mubr.f32.mxu0 (!%p209_p3), %v535_v3  ;;  %v290_v4 = vld [vmem:[%s623_s4] sm:$0xff] (!%p209_p3)  ;;  %v266_v6 = vunpack.c.l.s4 (!%p209_p3), %v536_v5  ;;  %v269_v9 = vshrl.u32 (!%p209_p3), %v268_v7, 7  ;;  %vm381_vm2 = vcmask (!%p209_p3), 7168   ;;  %vm388_vm3 = vcmask (!%p209_p3), 15368  }
   0x9   : > { %293 = vperm.xlu1 (!%p209_p3), %509, %v290_v4   ;;  %v289_v20 = vld [vmem:[%s622_s3] sm:$0xff] (!%p209_p3) }
   0xa   : > { %v267_v8 = vunpack.c.0.s8 (!%p209_p3), %v266_v6 }
   0xc   : > { %277 = vperm.xlu0 (!%p209_p3), %508, %v274_v2   ;;  %v270_v10 = vsub.s32 (!%p209_p3), %v267_v8, %v269_v9 }
   0xe   : > { %s630_s18 = smov (!%p243_p4, %s524_s18), 1 }
   0xf   : > { %s480_s28 = sshll.u32 %s630_s18, 3 }
  0x10   : > { %s250_s6 = scalar_lea.vmem %s619_s0, %s480_s28  ;;  %s258_s11 = scalar_lea.vmem %s624_s5, %s480_s28 }
  0x11   : > { %v259_v13 = vld [vmem:[%s250_s6] sm:$0xff] }
  0x87   : > { %v264_v11 = vpop.permute.xlu0 %263 }
  0x88   : > { %v271_v12 = vrot.slane %v264_v11, %v270_v10  ;;  %v294_v21 = vpop.permute.xlu1 %293 }
  0x8a   : > { %v273_v15 = vmul.f32 %v271_v12, %v259_v13 }
  0x8b   : > { %v278_v14 = vpop.permute.xlu0 %277 }
  0x8c   : > { %v285_v16 = vrot.slane %v278_v14, %v270_v10 }
  0x8e   : > { %v287_v17 = vadd.f32 %v285_v16, %v273_v15 }
  0x90   : > { %v288_v18 = vmax.f32 %v287_v17, 0.0 }
  0x92   : > { %v297_v19 = vcombine.high %v288_v18, %v288_v18 }
  0x94   : > { %475 = vmatprep.subr.msk.mxu0 %vm302_vm0, %v297_v19 }
  0x95   : > { %476 = vmatpush1.msk.msra.mxu0 %vm302_vm0, %v288_v18 }
  0x96   : > { %477 = vmatmul.mubr.msk.f32.vlgmr.msra.gmra.mrb[0].mxu0 %vm298_vm1, %v289_v20 }
 0x169   : > { %v373_v22 = vpop.f32.mrb[0].mxu0 }
 0x16a   : > { %v374_v23 = vadd.f32 %v373_v22, %v294_v21  ;;  %v375_v24 = vpop.f32.mrb[1].mxu0 }
 0x16b   : > { %v376_v25 = vadd.f32 %v375_v24, %v294_v21 }
 0x16c   : > { %v383_v26 = vmul.f32 %v374_v23, %v374_v23 }
 0x16d   : > { %v384_v27 = vmul.f32 %v376_v25, %v376_v25  ;;  %v378_v28 = vadd.f32 %v376_v25, %v374_v23 }
 0x16f   : > { %379 = vadd.xlane.f32.xlu1 %v378_v28  ;;  %v385_v29 = vadd.f32 %v384_v27, %v383_v26 }
 0x171   : > { %386 = vadd.xlane.f32.xlu0 %v385_v29 }
 0x1fc   : > { %v380_v30 = vpop.xlane.xlu1 %379 }
 0x1fd   : > { %382 = vst.msk [vmem:[%s258_s11] sm:$0xff] %vm381_vm2, %v380_v30 }
 0x1fe   : > { %v387_v31 = vpop.xlane.xlu0 %386 }
 0x1ff   : > { %389 = vst.msk [vmem:[%s258_s11] sm:$0xff] %vm388_vm3, %v387_v31 }
 0x200 PF: > { %s15_s20 = sadd.s32 1, %s532_s20   ;;  %s625_s18 = smov %s528_s19 }
 0x201   : > { %p12_p5 = scmp.ge.s32.totalorder %s15_s20, 4   ;;  %s626_s19 = smov %s628_s21 }
 0x203   :  { %14 = sbr.rel (!%p12_p5) target bundleno = 2 (0x2), region = 70 }

// kernel: hourglass_residual.7
= control target key start
LH: loop header
LB: loop body
LE: loop exit
PB: predicated region body
PF: predicated region fallthrough
CT: control target
= control target key end

     0   :  { %s981_s21 = smov 0   ;;  %s983_s22 = smov 0   ;;  %s1061_s0 = inlined_call_operand.vmem [shape: f32[2,4,256], index: 0, kind: input, shape index: {}]   ;;  %s1062_s1 = inlined_call_operand.vmem [shape: f32[2,4,256], index: 1, kind: input, shape index: {}]   ;;  %s1063_s2 = inlined_call_operand.vmem [shape: f32[4,1], index: 2, kind: input, shape index: {}]   ;;  %s1064_s3 = inlined_call_operand.vmem [shape: f32[4,1], index: 3, kind: input, shape index: {}]   ;;  %s1065_s4 = inlined_call_operand.vmem [shape: f32[8,4], index: 4, kind: input, shape index: {}]   ;;  %s1066_s5 = inlined_call_operand.vmem [shape: f32[8,1], index: 5, kind: input, shape index: {}]   ;;  %s1067_s6 = inlined_call_operand.vmem [shape: f32[8,1], index: 6, kind: input, shape index: {}]   ;;  %s1068_s7 = inlined_call_operand.vmem [shape: f32[8,1], index: 7, kind: input, shape index: {}]   ;;  %s1069_s8 = inlined_call_operand.vmem [shape: f32[8,4], index: 8, kind: input, shape index: {}]   ;;  %s1070_s9 = inlined_call_operand.vmem [shape: f32[8,1], index: 9, kind: input, shape index: {}]   ;;  %s1071_s10 = inlined_call_operand.vmem [shape: f32[8,1], index: 10, kind: input, shape index: {}]   ;;  %s1072_s11 = inlined_call_operand.vmem [shape: f32[8,1], index: 11, kind: input, shape index: {}]   ;;  %s1073_s12 = inlined_call_operand.vmem [shape: f32[2,8,256], index: 12, kind: output, shape index: {}]  }
   0x1   :  { %s985_s23 = smov 0  }
   0x2 LB: > { %s34_s24 = sadd.s32 1, %s907_s22  ;;  %p841_p0 = scmp.ge.s32.totalorder %s911_s23, 1  ;;  %s911_s23 = sphi %s985_s23, %s22_s23   ;;  %s907_s22 = sphi %s983_s22, %s1075_s22   ;;  %s903_s21 = sphi %s981_s21, %s1074_s21  }
   0x3   : > { %p36_p1 = scmp.ge.s32.totalorder %s34_s24, 2  ;;  %p400_p2 = scmp.lt.s32.totalorder %s911_s23, 3 }
   0x5   : > { %s1077_s24 = smov (%p36_p1, %s34_s24), 0  ;;  %p401_p3 = pnand %p841_p0, %p400_p2 }
   0x6   : > { %v490_v0 = vld [vmem:[%s1063_s2] sm:$0xf] (!%p401_p3)  ;;  %p460_p4 = scmp.lt.s32.totalorder (!%p401_p3), %s903_s21, 1  ;;  %v913_v1 = vmov (!%p401_p3), 0   ;;  %v914_v2 = vmov (!%p401_p3), 0.0   ;;  %vm532_vm0 = vcmask (!%p401_p3), 1043456   ;;  %v498_v15 = vlaneseq (!%p401_p3) }
   0x7   : > { %404 = sbr.rel (%p401_p3) target bundleno = 374 (0x176), region = 68  ;;  %886 = vset.pattern.permute.xlu0 (!%p401_p3), %v913_v1  ;;  %887 = vset.pattern.permute.xlu1 (!%p401_p3), %v913_v1  ;;  %v504_v3 = vld [vmem:[%s1064_s3] sm:$0xf] (!%p401_p3)  ;;  %vm528_vm1 = vcmask (!%p401_p3), 31744   ;;  %v915_v13 = vmov (!%p401_p3), 839922192  }
   0x8   : > { %493 = vperm.xlu0 (!%p401_p3), %886, %v490_v0   ;;  %705 = vmatprep.mubr.f32.mxu1 (!%p401_p3), %v914_v2  ;;  %v626_v6 = vld [vmem:[%s1070_s9] sm:$0xff] (!%p401_p3)  ;;  %v496_v14 = vunpack.c.l.s4 (!%p401_p3), %v915_v13  ;;  %v499_v17 = vshrl.u32 (!%p401_p3), %v498_v15, 7 }
   0x9   : > { %601 = vmatprep.mubr.f32.mxu0 (!%p401_p3), %v914_v2  ;;  %v624_v7 = vld [vmem:[%s1069_s8] sm:$0xff] (!%p401_p3) }
   0xa   : > { %v712_v8 = vld [vmem:[%s1071_s10] sm:$0xff] (!%p401_p3)  ;;  %v497_v16 = vunpack.c.0.s8 (!%p401_p3), %v496_v14 }
   0xb   : > { %v520_v9 = vld [vmem:[%s1066_s5] sm:$0xff] (!%p401_p3) }
   0xc   : > { %507 = vperm.xlu0 (!%p401_p3), %886, %v504_v3   ;;  %523 = vperm.xlu1 (!%p401_p3), %887, %v520_v9   ;;  %v608_v10 = vld [vmem:[%s1067_s6] sm:$0xff] (!%p401_p3)  ;;  %v500_v18 = vsub.s32 (!%p401_p3), %v497_v16, %v499_v17 }
   0xd   : > { %v616_v11 = vld [vmem:[%s1068_s7] sm:$0xff] (!%p401_p3) }
   0xe   : > { %s1079_s21 = smov (!%p460_p4, %s903_s21), 1  ;;  %v722_v12 = vld [vmem:[%s1072_s11] sm:$0xff] }
   0xf   : > { %s856_s29 = sshll.u32 %s1079_s21, 3  ;;  %v519_v28 = vld [vmem:[%s1065_s4] sm:$0xff] }
  0x10   : > { %s477_s14 = scalar_lea.vmem %s1062_s1, %s856_s29  ;;  %629 = vperm.xlu0 %886, %v626_v6   ;;  %611 = vperm.xlu1 %887, %v608_v10   ;;  %s467_s18 = scalar_lea.vmem %s1061_s0, %s856_s29 }
  0x11   : > { %v625_v4 = vld [vmem:[%s477_s14] sm:$0xff]  ;;  %s858_s29 = sshll.u32 %s1079_s21, 4 }
  0x12   : > { %v633_v5 = vcombine.high %v625_v4, %v625_v4  ;;  %v489_v21 = vld [vmem:[%s467_s18] sm:$0xff]  ;;  %s487_s27 = scalar_lea.vmem %s1073_s12, %s858_s29 }
  0x14   : > { %851 = vmatprep.subr.msk.mxu1 %vm532_vm0, %v633_v5  ;;  %715 = vperm.xlu0 %886, %v712_v8  }
  0x15   : > { %852 = vmatpush1.msk.msra.mxu1 %vm532_vm0, %v625_v4  ;;  %619 = vperm.xlu1 %887, %v616_v11  }
  0x16   : > { %853 = vmatmul.mubr.msk.f32.vlgmr.msra.gmra.mrb[0].mxu1 %vm528_vm1, %v624_v7 }
  0x19   : > { %725 = vperm.xlu1 %887, %v722_v12  }
  0x87   : > { %v494_v19 = vpop.permute.xlu0 %493 }
  0x88   : > { %v501_v20 = vrot.slane %v494_v19, %v500_v18 }
  0x8a   : > { %v503_v23 = vmul.f32 %v501_v20, %v489_v21 }
  0x8b   : > { %v508_v22 = vpop.permute.xlu0 %507  ;;  %v524_v31 = vpop.permute.xlu1 %523 }
  0x8c   : > { %v515_v24 = vrot.slane %v508_v22, %v500_v18 }
  0x8e   : > { %v517_v25 = vadd.f32 %v515_v24, %v503_v23 }
  0x8f   : > { %v612_v32 = vpop.permute.xlu1 %611  ;;  %v630_v33 = vpop.permute.xlu0 %629 }
  0x90   : > { %v518_v26 = vmax.f32 %v517_v25, 0.0 }
  0x92   : > { %v527_v27 = vcombine.high %v518_v26, %v518_v26 }
  0x93   : > { %v716_v42 = vpop.permute.xlu0 %715 }
  0x94   : > { %848 = vmatprep.subr.msk.mxu0 %vm532_vm0, %v527_v27  ;;  %v620_v39 = vpop.permute.xlu1 %619 }
  0x95   : > { %849 = vmatpush1.msk.msra.mxu0 %vm532_vm0, %v518_v26 }
  0x96   : > { %850 = vmatmul.mubr.msk.f32.vlgmr.msra.gmra.mrb[0].mxu0 %vm528_vm1, %v519_v28 }
  0x98   : > { %v726_v49 = vpop.permute.xlu1 %725 }
  0xe9   : > { %v707_v29 = vpop.f32.mrb[0].mxu1 }
  0xea   : > { %v709_v30 = vpop.f32.mrb[1].mxu1  ;;  %v708_v35 = vadd.f32 %v707_v29, %v630_v33 }
  0xeb   : > { %v710_v38 = vadd.f32 %v709_v30, %v630_v33 }
  0xec   : > { %v718_v44 = vmul.f32 %v716_v42, %v708_v35 }
  0xed   : > { %v719_v46 = vmul.f32 %v716_v42, %v710_v38 }
 0x169   : > { %v603_v34 = vpop.f32.mrb[0].mxu0 }
 0x16a   : > { %v604_v36 = vadd.f32 %v603_v34, %v524_v31  ;;  %v605_v37 = vpop.f32.mrb[1].mxu0 }
 0x16b   : > { %v606_v40 = vadd.f32 %v605_v37, %v524_v31 }
 0x16c   : > { %v614_v41 = vmul.f32 %v612_v32, %v604_v36 }
 0x16d   : > { %v615_v43 = vmul.f32 %v612_v32, %v606_v40 }
 0x16e   : > { %v622_v45 = vadd.f32 %v620_v39, %v614_v41 }
 0x16f   : > { %v623_v47 = vadd.f32 %v620_v39, %v615_v43 }
 0x170   : > { %v720_v48 = vadd.f32 %v718_v44, %v622_v45 }
 0x171   : > { %v721_v50 = vadd.f32 %v719_v46, %v623_v47 }
 0x172   : > { %v728_v51 = vadd.f32 %v726_v49, %v720_v48 }
 0x173   : > { %v729_v52 = vadd.f32 %v726_v49, %v721_v50 }
 0x174   : > { %730 = vst [vmem:[%s487_s27] sm:$0xff] %v728_v51 }
 0x175   : > { %731 = vst [vmem:[%s487_s27 + $0x8] sm:$0xff] %v729_v52 }
 0x176 PF: > { %s22_s23 = sadd.s32 1, %s911_s23   ;;  %s1074_s21 = smov %s907_s22 }
 0x177   : > { %p19_p5 = scmp.ge.s32.totalorder %s22_s23, 4   ;;  %s1075_s22 = smov %s1077_s24 }
 0x179   :  { %21 = sbr.rel (!%p19_p5) target bundleno = 2 (0x2), region = 101 }

// kernel: hourglass_residual.5
= control target key start
LH: loop header
LB: loop body
LE: loop exit
PB: predicated region body
PF: predicated region fallthrough
CT: control target
= control target key end

     0   :  { %s1534_s24 = smov 0   ;;  %s1697_s0 = inlined_call_operand.vmem [shape: f32[2,4,256], index: 0, kind: input, shape index: {}]   ;;  %s1698_s1 = inlined_call_operand.vmem [shape: f32[4,1], index: 1, kind: input, shape index: {}]   ;;  %s1699_s2 = inlined_call_operand.vmem [shape: f32[4,1], index: 2, kind: input, shape index: {}]   ;;  %s1700_s3 = inlined_call_operand.vmem [shape: f32[9,4,4], index: 3, kind: input, shape index: {}]   ;;  %s1701_s4 = inlined_call_operand.vmem [shape: f32[4,1], index: 4, kind: input, shape index: {}]   ;;  %s1702_s5 = inlined_call_operand.vmem [shape: f32[9,1,256], index: 5, kind: input, shape index: {}]   ;;  %s1703_s6 = inlined_call_operand.vmem [shape: f32[2,4,256], index: 6, kind: output, shape index: {0}]   ;;  %s1704_s7 = inlined_call_operand.vmem [shape: f32[2,4,2], index: 7, kind: output, shape index: {1}]  }
   0x1 LB: > { %s1382_s25 = sadd.s32 4294967295, %s1481_s24   ;;  %p1386_p0 = scmp.ge.s32.totalorder %s1481_s24, 1  ;;  %s1481_s24 = sphi %s1534_s24, %s18_s24  }
   0x2   : > { %p240_p1 = scmp.lt.s32.totalorder %s1481_s24, 3 }
   0x4   : > { %p241_p2 = pnand %p1386_p0, %p240_p1 }
   0x5   : > { %v291_v0 = vld [vmem:[%s1698_s1] sm:$0xf] (!%p241_p2)  ;;  %v1483_v1 = vmov (!%p241_p2), 0   ;;  %p276_p3 = scmp.lt.s32.totalorder (!%p241_p2), %s1382_s25, 1  ;;  %v1484_v3 = vmov (!%p241_p2), 839922192   ;;  %v299_v5 = vlaneseq (!%p241_p2) }
   0x6   : > { %244 = sbr.rel (%p241_p2) target bundleno = 663 (0x297), region = 44  ;;  %1474 = vset.pattern.permute.xlu0 (!%p241_p2), %v1483_v1  ;;  %v305_v2 = vld [vmem:[%s1699_s2] sm:$0xf] (!%p241_p2)  ;;  %v297_v4 = vunpack.c.l.s4 (!%p241_p2), %v1484_v3  ;;  %v1410_v12 = vld [vmem:[%s1702_s5 + $0x8] sm:$0x3] (!%p241_p2)  ;;  %v1485_v17 = vmov (!%p241_p2), 0.0  }
   0x7   : > { %294 = vperm.xlu0 (!%p241_p2), %1474, %v291_v0   ;;  %v300_v7 = vshrl.u32 (!%p241_p2), %v299_v5, 7  ;;  %834 = vmatprep.mubr.f32.mxu0 (!%p241_p2), %v1485_v17  ;;  %s1486_s13 = smov (!%p241_p2), 127   ;;  %s1487_s14 = smov (!%p241_p2), 16   ;;  %vm375_vm0 = vcmask (!%p241_p2), 1043456   ;;  %vm371_vm1 = vcmask (!%p241_p2), 31744   ;;  %v1577_v29 = vand.u32 (!%p241_p2), 127, %v299_v5 }
   0x8   : > { %v298_v6 = vunpack.c.0.s8 (!%p241_p2), %v297_v4  ;;  %446 = vmatprep.mubr.f32.mxu1 (!%p241_p2), %v1485_v17  ;;  %v1411_v27 = vld [vmem:[%s1700_s3 + $0x10] sm:$0xf] (!%p241_p2)  ;;  %s1488_s17 = smov (!%p241_p2), 17   ;;  %s1489_s18 = smov (!%p241_p2), 113   ;;  %v1267_v28 = vld [vmem:[%s1701_s4] sm:$0xf] (!%p241_p2) }
   0x9   : > { %v1551_v9 = vsub.s32 (!%p241_p2), 0, %v300_v7  ;;  %v1553_v10 = vsub.s32 (!%p241_p2), 1, %v300_v7  ;;  %s1490_s19 = smov (!%p241_p2), 15   ;;  %s1491_s20 = smov (!%p241_p2), 112   ;;  %v1392_v32 = vld [vmem:[%s1702_s5 + $0x2] sm:$0x3] (!%p241_p2) }
   0xa   : > { %v301_v8 = vsub.s32 (!%p241_p2), %v298_v6, %v300_v7  ;;  %s1492_s21 = smov (!%p241_p2), 1   ;;  %s1493_s22 = smov (!%p241_p2), 111   ;;  %vm351_vm2 = vcmp.lt.s32.totalorder (!%p241_p2), %v1577_v29, 16  ;;  %v1415_v36 = vld [vmem:[%s1702_s5 + $0xa] sm:$0x3] (!%p241_p2)  ;;  %vm847_vm3 = vcmp.lt.s32.totalorder (!%p241_p2), %v1577_v29, 127 }
   0xb   : > { %308 = vperm.xlu0 (!%p241_p2), %1474, %v305_v2   ;;  %v751_v15 = vrot.slane (!%p241_p2), %v1410_v12, %v1551_v9  ;;  %v755_v16 = vrot.slane (!%p241_p2), %v1410_v12, %v1553_v10  ;;  %v360_v33 = vrot.slane (!%p241_p2), %v1392_v32, %v1551_v9  ;;  %v364_v34 = vrot.slane (!%p241_p2), %v1392_v32, %v1553_v10  ;;  %v1393_v44 = vld [vmem:[%s1700_s3 + $0x4] sm:$0xf] (!%p241_p2)  ;;  %v332_v45 = vld [vmem:[%s1702_s5] sm:$0x3] (!%p241_p2)  ;;  %v1416_v54 = vld [vmem:[%s1700_s3 + $0x14] sm:$0xf] (!%p241_p2) }
   0xc   : > { %v856_v42 = vrot.slane (!%p241_p2), %v1415_v36, %v1551_v9  ;;  %v860_v43 = vrot.slane (!%p241_p2), %v1415_v36, %v1553_v10  ;;  %vm329_vm4 = vcmp.lt.s32.totalorder (!%p241_p2), %v1577_v29, 17  ;;  %v337_v52 = vrot.slane (!%p241_p2), %v332_v45, %v1551_v9  ;;  %v1420_v55 = vld [vmem:[%s1702_s5 + $0xc] sm:$0x3] (!%p241_p2)  ;;  %v346_v0 = vld [vmem:[%s1700_s3] sm:$0xf] (!%p241_p2) }
   0xd   : > { %s1706_s25 = smov (!%p276_p3, %s1382_s25), 1  ;;  %v756_v22 = vcombine.low %v751_v15, %v755_v16  ;;  %v341_v53 = vrot.slane %v332_v45, %v1553_v10  ;;  %vm953_vm5 = vcmp.lt.s32.totalorder %v1577_v29, 113  ;;  %v962_v62 = vrot.slane %v1420_v55, %v1551_v9  ;;  %v1400_v1 = vld [vmem:[%s1702_s5 + $0x4] sm:$0x3]  ;;  %v1425_v12 = vld [vmem:[%s1702_s5 + $0xe] sm:$0x3] }
   0xe   : > { %s1437_s30 = sshll.u32 %s1706_s25, 3  ;;  %v966_v63 = vrot.slane %v1420_v55, %v1553_v10  ;;  %vm537_vm6 = vcmp.lt.s32.totalorder %v1577_v29, 15  ;;  %v546_v7 = vrot.slane %v1400_v1, %v1551_v9  ;;  %vm1059_vm7 = vcmp.lt.s32.totalorder %v1577_v29, 112 }
   0xf   : > { %s280_s10 = scalar_lea.vmem %s1697_s0, %s1437_s30  ;;  %vm643_vm8 = vcmp.lt.s32.totalorder %v1577_v29, 1  ;;  %vm1165_vm9 = vcmp.lt.s32.totalorder %v1577_v29, 111  ;;  %vm1285_vm10 = vcmask 3072   ;;  %vm1294_vm11 = vcmask 11272  }
  0x10   : > { %v290_v14 = vld [vmem:[%s280_s10] sm:$0xff] }
  0x86   : > { %v295_v11 = vpop.permute.xlu0 %294 }
  0x87   : > { %v302_v13 = vrot.slane %v295_v11, %v301_v8  ;;  %v1421_v11 = vld [vmem:[%s1700_s3 + $0x18] sm:$0xf] }
  0x89   : > { %v304_v19 = vmul.f32 %v302_v13, %v290_v14 }
  0x8a   : > { %v309_v18 = vpop.permute.xlu0 %308 }
  0x8b   : > { %v316_v20 = vrot.slane %v309_v18, %v301_v8  ;;  %v550_v8 = vrot.slane %v1400_v1, %v1553_v10 }
  0x8d   : > { %v318_v21 = vadd.f32 %v316_v20, %v304_v19  ;;  %v1068_v20 = vrot.slane %v1425_v12, %v1551_v9 }
  0x8f   : > { %v319_v23 = vmax.f32 %v318_v21, 0.0  ;;  %v1072_v21 = vrot.slane %v1425_v12, %v1553_v10 }
  0x91   : > { %843 = vrot.lane.b32.xlu0 %v319_v23, %s1486_s13  ;;  %347 = vrot.lane.b32.xlu1 %v319_v23, %s1487_s14  ;;  %v758_v24 = vmul.f32 %v756_v22, %v319_v23  ;;  %v321_v26 = vcombine.high %v319_v23, %v319_v23  ;;  %v1401_v22 = vld [vmem:[%s1700_s3 + $0x8] sm:$0xf] }
  0x93   : > { %v762_v25 = vcombine.high %v758_v24, %v758_v24 }
  0x95   : > { %323 = vrot.lane.b32.xlu0 %v319_v23, %s1488_s17  ;;  %1412 = vmatprep.subr.msk.mxu0 %vm375_vm0, %v762_v25 }
  0x96   : > { %349 = vrot.lane.b32.xlu1 %v321_v26, %s1487_s14  ;;  %1413 = vmatpush1.msk.msra.mxu0 %vm375_vm0, %v758_v24 }
  0x97   : > { %1414 = vmatmul.mubr.msk.f32.vlgmr.msra.gmra.mrb[0].mxu0 %vm371_vm1, %v1411_v27 }
  0x98   : > { %940 = vmatprep.mubr.f32.mxu0 %v1485_v17 }
  0x99   : > { %949 = vrot.lane.b32.xlu0 %v319_v23, %s1489_s18 }
  0x9a   : > { %845 = vrot.lane.b32.xlu1 %v321_v26, %s1486_s13 }
  0x9d   : > { %533 = vrot.lane.b32.xlu0 %v319_v23, %s1490_s19 }
  0x9e   : > { %325 = vrot.lane.b32.xlu1 %v321_v26, %s1488_s17 }
  0xa1   : > { %1055 = vrot.lane.b32.xlu0 %v319_v23, %s1491_s20 }
  0xa2   : > { %951 = vrot.lane.b32.xlu1 %v321_v26, %s1489_s18 }
  0xa5   : > { %639 = vrot.lane.b32.xlu0 %v319_v23, %s1492_s21 }
  0xa6   : > { %535 = vrot.lane.b32.xlu1 %v321_v26, %s1490_s19  ;;  %s285_s19 = scalar_lea.vmem %s1703_s6, %s1437_s30 }
  0xa9   : > { %1161 = vrot.lane.b32.xlu0 %v319_v23, %s1493_s22  ;;  %v1405_v23 = vld [vmem:[%s1702_s5 + $0x6] sm:$0x3] }
  0xaa   : > { %1057 = vrot.lane.b32.xlu1 %v321_v26, %s1491_s20  ;;  %v656_v32 = vrot.slane %v1405_v23, %v1553_v10  ;;  %s1391_s20 = sshll.u32 %s1706_s25, 2 }
  0xab   : > { %s289_s30 = scalar_lea.vmem %s1704_s7, %s1391_s20 }
  0xad   : > { %1270 = vperm.xlu0 %1474, %v1267_v28  }
  0xae   : > { %641 = vrot.lane.b32.xlu1 %v321_v26, %s1492_s21 }
  0xb2   : > { %1163 = vrot.lane.b32.xlu1 %v321_v26, %s1493_s22 }
 0x103   : > { %v844_v30 = vpop.permute.xlu0 %843  ;;  %v348_v31 = vpop.permute.xlu1 %347 }
 0x107   : > { %v324_v35 = vpop.permute.xlu0 %323 }
 0x108   : > { %v350_v37 = vpop.permute.xlu1 %349 }
 0x109   : > { %v352_v38 = vsel %vm351_vm2, %v348_v31, %v350_v37  ;;  %v353_v39 = vsel %vm351_vm2, %v350_v37, %v348_v31  ;;  %v652_v31 = vrot.slane %v1405_v23, %v1551_v9 }
 0x10a   : > { %v367_v40 = vmul.f32 %v360_v33, %v353_v39  ;;  %v368_v41 = vmul.f32 %v364_v34, %v352_v38  ;;  %v1426_v33 = vld [vmem:[%s1700_s3 + $0x1c] sm:$0xf]  ;;  %v1430_v34 = vld [vmem:[%s1702_s5 + $0x10] sm:$0x3] }
 0x10b   : > { %v950_v46 = vpop.permute.xlu0 %949 }
 0x10c   : > { %1394 = vmatprep.subr.msk.mxu1 %vm375_vm0, %v368_v41  ;;  %v846_v47 = vpop.permute.xlu1 %845  ;;  %v1178_v41 = vrot.slane %v1430_v34, %v1553_v10 }
 0x10d   : > { %v848_v48 = vsel %vm847_vm3, %v844_v30, %v846_v47  ;;  %v849_v49 = vsel %vm847_vm3, %v846_v47, %v844_v30  ;;  %1395 = vmatpush1.msk.msra.mxu1 %vm375_vm0, %v367_v40  ;;  %v1174_v40 = vrot.slane %v1430_v34, %v1551_v9  ;;  %v1431_v9 = vld [vmem:[%s1700_s3 + $0x20] sm:$0xf] }
 0x10e   : > { %v863_v50 = vmul.f32 %v856_v42, %v848_v48  ;;  %v864_v51 = vmul.f32 %v860_v43, %v849_v49  ;;  %1396 = vmatmul.mubr.msk.f32.vlgmr.msra.gmra.mrb[0].mxu1 %vm371_vm1, %v1393_v44  ;;  %v1406_v42 = vld [vmem:[%s1700_s3 + $0xc] sm:$0xf] }
 0x10f   : > { %526 = vmatprep.mubr.f32.mxu1 %v1485_v17  ;;  %v534_v59 = vpop.permute.xlu0 %533 }
 0x110   : > { %1417 = vmatprep.subr.msk.mxu0 %vm375_vm0, %v864_v51  ;;  %v326_v56 = vpop.permute.xlu1 %325 }
 0x111   : > { %v330_v57 = vsel %vm329_vm4, %v324_v35, %v326_v56  ;;  %v331_v58 = vsel %vm329_vm4, %v326_v56, %v324_v35  ;;  %1418 = vmatpush1.msk.msra.mxu0 %vm375_vm0, %v863_v50 }
 0x112   : > { %v344_v60 = vmul.f32 %v337_v52, %v331_v58  ;;  %v345_v61 = vmul.f32 %v341_v53, %v330_v57  ;;  %1419 = vmatmul.mubr.msk.f32.vlgmr.msra.gmra.mrb[0].mxu0 %vm371_vm1, %v1416_v54 }
 0x113   : > { %1046 = vmatprep.mubr.f32.mxu0 %v1485_v17  ;;  %v1056_v13 = vpop.permute.xlu0 %1055 }
 0x114   : > { %1397 = vmatprep.subr.msk.mxu1 %vm375_vm0, %v345_v61  ;;  %v952_v2 = vpop.permute.xlu1 %951 }
 0x115   : > { %v954_v3 = vsel %vm953_vm5, %v950_v46, %v952_v2  ;;  %v955_v4 = vsel %vm953_vm5, %v952_v2, %v950_v46  ;;  %1398 = vmatpush1.msk.msra.mxu1 %vm375_vm0, %v344_v60 }
 0x116   : > { %v969_v5 = vmul.f32 %v962_v62, %v954_v3  ;;  %v970_v6 = vmul.f32 %v966_v63, %v955_v4  ;;  %1399 = vmatmul.mubr.msk.f32.vlgmr.msra.gmra.mrb[0].mxu1 %vm371_vm1, %v346_v0 }
 0x117   : > { %630 = vmatprep.mubr.f32.mxu1 %v1485_v17  ;;  %v640_v27 = vpop.permute.xlu0 %639 }
 0x118   : > { %1422 = vmatprep.subr.msk.mxu0 %vm375_vm0, %v970_v6  ;;  %v536_v14 = vpop.permute.xlu1 %535 }
 0x119   : > { %v538_v15 = vsel %vm537_vm6, %v534_v59, %v536_v14  ;;  %v539_v16 = vsel %vm537_vm6, %v536_v14, %v534_v59  ;;  %1423 = vmatpush1.msk.msra.mxu0 %vm375_vm0, %v969_v5 }
 0x11a   : > { %v553_v18 = vmul.f32 %v546_v7, %v539_v16  ;;  %v554_v19 = vmul.f32 %v550_v8, %v538_v15  ;;  %1424 = vmatmul.mubr.msk.f32.vlgmr.msra.gmra.mrb[0].mxu0 %vm371_vm1, %v1421_v11 }
 0x11b   : > { %1152 = vmatprep.mubr.f32.mxu0 %v1485_v17  ;;  %v1162_v43 = vpop.permute.xlu0 %1161 }
 0x11c   : > { %1402 = vmatprep.subr.msk.mxu1 %vm375_vm0, %v554_v19  ;;  %v1058_v24 = vpop.permute.xlu1 %1057 }
 0x11d   : > { %v1060_v25 = vsel %vm1059_vm7, %v1056_v13, %v1058_v24  ;;  %v1061_v26 = vsel %vm1059_vm7, %v1058_v24, %v1056_v13  ;;  %1403 = vmatpush1.msk.msra.mxu1 %vm375_vm0, %v553_v18 }
 0x11e   : > { %v1075_v28 = vmul.f32 %v1068_v20, %v1060_v25  ;;  %v1076_v30 = vmul.f32 %v1072_v21, %v1061_v26  ;;  %1404 = vmatmul.mubr.msk.f32.vlgmr.msra.gmra.mrb[0].mxu1 %vm371_vm1, %v1401_v22 }
 0x11f   : > { %736 = vmatprep.mubr.f32.mxu1 %v1485_v17 }
 0x120   : > { %1427 = vmatprep.subr.msk.mxu0 %vm375_vm0, %v1076_v30  ;;  %v642_v35 = vpop.permute.xlu1 %641 }
 0x121   : > { %v644_v36 = vsel %vm643_vm8, %v640_v27, %v642_v35  ;;  %v645_v37 = vsel %vm643_vm8, %v642_v35, %v640_v27  ;;  %1428 = vmatpush1.msk.msra.mxu0 %vm375_vm0, %v1075_v28 }
 0x122   : > { %v659_v38 = vmul.f32 %v652_v31, %v645_v37  ;;  %v660_v39 = vmul.f32 %v656_v32, %v644_v36  ;;  %1429 = vmatmul.mubr.msk.f32.vlgmr.msra.gmra.mrb[0].mxu0 %vm371_vm1, %v1426_v33 }
 0x123   : > { %1258 = vmatprep.mubr.f32.mxu0 %v1485_v17 }
 0x124   : > { %1407 = vmatprep.subr.msk.mxu1 %vm375_vm0, %v660_v39  ;;  %v1164_v44 = vpop.permute.xlu1 %1163 }
 0x125   : > { %v1166_v45 = vsel %vm1165_vm9, %v1162_v43, %v1164_v44  ;;  %v1167_v29 = vsel %vm1165_vm9, %v1164_v44, %v1162_v43  ;;  %1408 = vmatpush1.msk.msra.mxu1 %vm375_vm0, %v659_v38 }
 0x126   : > { %v1181_v46 = vmul.f32 %v1174_v40, %v1166_v45  ;;  %v1182_v47 = vmul.f32 %v1178_v41, %v1167_v29  ;;  %1409 = vmatmul.mubr.msk.f32.vlgmr.msra.gmra.mrb[0].mxu1 %vm371_vm1, %v1406_v42 }
 0x128   : > { %1432 = vmatprep.subr.msk.mxu0 %vm375_vm0, %v1182_v47 }
 0x129   : > { %1433 = vmatpush1.msk.msra.mxu0 %vm375_vm0, %v1181_v46 }
 0x12a   : > { %1434 = vmatmul.mubr.msk.f32.vlgmr.msra.gmra.mrb[0].mxu0 %vm371_vm1, %v1431_v9 }
 0x12c   : > { %v1271_v51 = vpop.permute.xlu0 %1270 }
 0x1f9   : > { %v738_v10 = vpop.f32.mrb[0].mxu1 }
 0x1fa   : > { %v740_v17 = vpop.f32.mrb[1].mxu1 }
 0x1fd   : > { %v1260_v48 = vpop.f32.mrb[0].mxu0 }
 0x1fe   : > { %v1439_v49 = vadd.f32 %v1260_v48, %v738_v10  ;;  %v1262_v50 = vpop.f32.mrb[1].mxu0 }
 0x1ff   : > { %v1440_v52 = vadd.f32 %v1262_v50, %v740_v17 }
 0x200   : > { %v1273_v53 = vadd.f32 %v1439_v49, %v1271_v51 }
 0x201   : > { %v1274_v54 = vadd.f32 %v1440_v52, %v1271_v51 }
 0x202   : > { %v1280_v55 = vsel %vm375_vm0, %v1273_v53, 0.0  ;;  %v1287_v56 = vmul.f32 %v1273_v53, %v1273_v53 }
 0x203   : > { %v1277_v57 = vcombine.low %v1273_v53, %v1274_v54  ;;  %v1281_v58 = vsel %vm375_vm0, %v1274_v54, 0.0  ;;  %v1288_v59 = vmul.f32 %v1274_v54, %v1274_v54 }
 0x204   : > { %v1282_v60 = vadd.f32 %v1281_v58, %v1280_v55  ;;  %v1289_v61 = vsel %vm375_vm0, %v1287_v56, 0.0 }
 0x205   : > { %1279 = vst [vmem:[%s285_s19] sm:$0xff] %v1277_v57  ;;  %v1290_v62 = vsel %vm375_vm0, %v1288_v59, 0.0 }
 0x206   : > { %1283 = vadd.xlane.f32.xlu1 %v1282_v60  ;;  %v1291_v63 = vadd.f32 %v1290_v62, %v1289_v61 }
 0x208   : > { %1292 = vadd.xlane.f32.xlu0 %v1291_v63 }
 0x293   : > { %v1284_v0 = vpop.xlane.xlu1 %1283 }
 0x294   : > { %1286 = vst.msk [vmem:[%s289_s30] sm:$0xf] %vm1285_vm10, %v1284_v0 }
 0x295   : > { %v1293_v1 = vpop.xlane.xlu0 %1292 }
 0x296   : > { %1295 = vst.msk [vmem:[%s289_s30] sm:$0xf] %vm1294_vm11, %v1293_v1 }
 0x297 PF: > { %s18_s24 = sadd.s32 1, %s1481_s24  }
 0x298   : > { %p15_p4 = scmp.ge.s32.totalorder %s18_s24, 4  }
 0x29a   :  { %17 = sbr.rel (!%p15_p4) target bundleno = 1 (0x1), region = 102 }

</bundles_post_ra>
